<compile_context>
chip_gen: v5e
topology: v5e:2x2
jax: 0.10.0
libtpu: 0.0.40
codegen_flags: <defaults>
</compile_context>

<pallas_src>
import functools

import jax
import jax.numpy as jnp
from jax import lax
from jax.experimental import pallas as pl
from jax.experimental.pallas import tpu as pltpu


def _round_up(x, m):
    return ((x + m - 1) // m) * m


def _cdiv(a, b):
    return -(-a // b)


def _vmem_budget_bytes():
    """~72% of per-core VMEM (128 MiB on v5e/v6e, 64 MiB on v7x)."""
    try:
        cap = int(pltpu.get_tpu_info().vmem_capacity_bytes)
    except Exception:
        cap = 64 << 20          # conservative fallback (v7x-sized)
    return int(cap * 0.72)


def _pointwise_dtype():
    """bf16 pointwise GELU on v6e/v7x (bf16 VALU/EUP); f32 on older chips."""
    try:
        kind = jax.devices()[0].device_kind.lower()
    except Exception:
        return jnp.float32
    for old in ("v2", "v3", "v4", "v5"):
        if old in kind:
            return jnp.float32
    return jnp.bfloat16


# ----------------------------------------------------------------------------
# Fused MCSwinTransformerBlock forward (layer_scale=None, drop=0, drop_path=0,
# pad_r=pad_l=0).  Grid = (row tiles, hidden slabs); weights broadcast across
# row tiles, LayerNorms computed once per row tile (hidden slab 0), fc2 partial
# products accumulated into an f32 VMEM scratch.
# ----------------------------------------------------------------------------
def _make_block_kernel(c_real, c_pad, *, eps=1e-5,
                       mm_dtype=jnp.bfloat16, pw_dtype=jnp.float32):
    inv_c = 1.0 / float(c_real)       # divide by the REAL channel count
    needs_mask = c_pad > c_real

    def kernel(x_ref, pp_ref, w1_ref, c1_ref, w2_ref, o_ref, acc_ref, y_ref):
        j = pl.program_id(1)

        @pl.when(j == 0)
        def _():
            x = x_ref[...].astype(jnp.float32)          # (Tr, Cp)
            pp = pp_ref[...]                            # (8, Cp): g1,b1,g2,b2,c2,0,0,0

            if needs_mask:
                lane = lax.broadcasted_iota(jnp.int32, x.shape, 1)
                lane_ok = lane < c_real
            else:
                lane_ok = None

            def layer_norm(t, g, b):
                # Two-pass mean/variance (no E[x^2]-E[x]^2 cancellation).
                # Padded lanes are masked out of the variance; g/b padded
                # lanes are zero, so padded lanes of the output stay zero and
                # the lane zero-padding remains exact end to end.
                mu = jnp.sum(t, axis=-1, keepdims=True) * inv_c
                d = t - mu
                if needs_mask:
                    d = jnp.where(lane_ok, d, 0.0)
                var = jnp.sum(d * d, axis=-1, keepdims=True) * inv_c
                return d * lax.rsqrt(var + eps) * g + b

            x1 = x + layer_norm(x, pp[0:1], pp[1:2])    # shortcut + norm1(x)
            acc_ref[...] = x1                           # running f32 result
            y_ref[...] = layer_norm(x1, pp[2:3], pp[3:4]).astype(mm_dtype)

        # One hidden-dim slab of the Mlp: fc1 slab -> GELU -> fc2 slab, accumulate.
        h1 = jnp.dot(y_ref[...], w1_ref[...], preferred_element_type=jnp.float32)
        h1 = (h1 + c1_ref[...]).astype(pw_dtype)
        # TODO(synk): PyTorch nn.GELU default is the exact erf form; the tanh
        # approximation is used to guarantee Mosaic lowering (~1e-3 deviation).
        h1 = 0.5 * h1 * (1.0 + jnp.tanh(
            0.7978845608028654 * (h1 + 0.044715 * h1 * h1 * h1)))
        acc_ref[...] += jnp.dot(h1.astype(mm_dtype), w2_ref[...],
                                preferred_element_type=jnp.float32)

        @pl.when(j == pl.num_programs(1) - 1)
        def _():
            o_ref[...] = (acc_ref[...] + pp_ref[4:5, :]).astype(o_ref.dtype)

    return kernel


def _plan_tiling(rows, Cp, Hp, x_itemsize, mm_itemsize, budget):
    """Pick (row_tile, hidden_slab, n_slabs) that fits the VMEM budget."""

    def footprint(rt, hs, nh):
        buf_w = 1 if nh == 1 else 2                    # resident weights: 1 buffer
        b = 2 * rt * Cp * x_itemsize                   # x tile (double-buffered)
        b += 2 * rt * Cp * x_itemsize                  # out tile (double-buffered)
        b += 8 * Cp * 4                                # packed params (1 buffer)
        b += buf_w * 2 * Cp * hs * mm_itemsize         # w1 + w2 slabs
        b += buf_w * 8 * hs * 4                        # c1 slab (sublane-padded)
        b += rt * Cp * 4 + rt * Cp * mm_itemsize       # acc + y scratch
        b += rt * hs * 4                               # h1 intermediate
        return b

    # Divisor-aware row tile: minimal dead-row padding, and >= 2 grid steps so
    # both v7x TensorCores get work under dimension_semantics=("parallel", ...).
    n_steps = max(_cdiv(rows, 256), 1)
    if n_steps < 2 and rows > 8:
        n_steps = 2
    row_tile = _round_up(_cdiv(rows, n_steps), 8)

    h_cands = [Hp] + [h for h in (1024, 512, 256, 128) if h < Hp and Hp % h == 0]
    while True:
        for hs in h_cands:
            nh = Hp // hs
            if footprint(row_tile, hs, nh) <= budget:
                return row_tile, hs, nh
        if row_tile <= 8:
            hs = h_cands[-1]
            return row_tile, hs, Hp // hs
        row_tile = max(8, _round_up(row_tile // 2, 8))


def mcswin_block_apply(x, pp, *, mm_dtype=jnp.bfloat16, pw_dtype=jnp.float32,
                       single_buffer=True):
    """Apply one fused MCSwinTransformerBlock to x of shape (B, N, C).

    `pp` holds pre-padded / pre-cast parameters (see _pad_block_params).
    bf16 MXU operands with f32 accumulation (documented accuracy relaxation).
    """
    B, N, C = x.shape
    w1, c1, w2, pack = pp["w1"], pp["c1"], pp["w2"], pp["pack"]
    Cp, Hp = w1.shape
    rows = B * N

    budget = _vmem_budget_bytes()
    row_tile, Hs, n_h = _plan_tiling(rows, Cp, Hp, x.dtype.itemsize,
                                     jnp.dtype(mm_dtype).itemsize, budget)
    rows_p = _round_up(rows, row_tile)

    x2 = jnp.pad(x.reshape(rows, C), ((0, rows_p - rows), (0, Cp - C)))

    def spec(shape, imap, const):
        # Constant-index (broadcast) blocks are DMA'd once; a single VMEM copy
        # suffices -> reclaim the second buffer.
        if single_buffer and const:
            return pl.BlockSpec(shape, imap, pipeline_mode=pl.Buffered(1))
        return pl.BlockSpec(shape, imap)

    kernel = _make_block_kernel(C, Cp, mm_dtype=mm_dtype, pw_dtype=pw_dtype)
    out = pl.pallas_call(
        kernel,
        out_shape=jax.ShapeDtypeStruct((rows_p, Cp), x.dtype),
        grid=(rows_p // row_tile, n_h),
        in_specs=[
            pl.BlockSpec((row_tile, Cp), lambda i, j: (i, 0)),    # x rows
            spec((8, Cp), lambda i, j: (0, 0), True),             # g1,b1,g2,b2,c2 pack
            spec((Cp, Hs), lambda i, j: (0, j), n_h == 1),        # fc1 weight slab (bf16)
            spec((1, Hs), lambda i, j: (0, j), n_h == 1),         # fc1 bias slab
            spec((Hs, Cp), lambda i, j: (j, 0), n_h == 1),        # fc2 weight slab (bf16)
        ],
        out_specs=pl.BlockSpec((row_tile, Cp), lambda i, j: (i, 0)),
        scratch_shapes=[
            pltpu.VMEM((row_tile, Cp), jnp.float32),   # acc: x1 + Mlp accumulation
            pltpu.VMEM((row_tile, Cp), mm_dtype),      # LN2 output (MXU operand)
        ],
        compiler_params=pltpu.CompilerParams(
            dimension_semantics=("parallel", "arbitrary"),
            vmem_limit_bytes=budget),
    )(x2, pack, w1, c1, w2)

    return out[:rows, :C].reshape(B, N, C)


def _pad_block_params(p, mm_dtype):
    """Pre-pad (lane-dense Cp/Hp multiples of 128) and pre-cast weights once."""
    C, H = p["w1"].shape
    Cp, Hp = _round_up(C, 128), _round_up(H, 128)

    def row(a, cols):
        a = a.reshape(1, -1).astype(jnp.float32)
        return jnp.pad(a, ((0, 0), (0, cols - a.shape[1])))

    pack = jnp.concatenate(
        [row(p["g1"], Cp), row(p["b1"], Cp), row(p["g2"], Cp), row(p["b2"], Cp),
         row(p["c2"], Cp), jnp.zeros((3, Cp), jnp.float32)], axis=0)
    w1 = jnp.pad(p["w1"], ((0, Cp - C), (0, Hp - H))).astype(mm_dtype)
    w2 = jnp.pad(p["w2"], ((0, Hp - H), (0, Cp - C))).astype(mm_dtype)
    c1 = row(p["c1"], Hp)
    return dict(pack=pack, w1=w1, c1=c1, w2=w2)


def _block_ref(x, params, eps=1e-5):
    """Pure-JAX f32 reference of the fused block (same tanh GELU)."""
    B, N, C = x.shape
    v = x.reshape(B * N, C).astype(jnp.float32)

    def ln(t, g, b):
        mu = jnp.mean(t, axis=-1, keepdims=True)
        var = jnp.mean(jnp.square(t - mu), axis=-1, keepdims=True)
        return (t - mu) * lax.rsqrt(var + eps) * g + b

    x1 = v + ln(v, params["g1"], params["b1"])
    y = ln(x1, params["g2"], params["b2"])
    h1 = y @ params["w1"] + params["c1"]
    h1 = 0.5 * h1 * (1.0 + jnp.tanh(
        0.7978845608028654 * (h1 + 0.044715 * h1 * h1 * h1)))
    out = x1 + (h1 @ params["w2"] + params["c2"])
    return out.reshape(B, N, C).astype(x.dtype)


def init_block_params(key, dim, mlp_ratio=4):
    hidden = int(dim * mlp_ratio)
    k1, k2 = jax.random.split(key)
    g1 = jnp.ones((1, dim), jnp.float32)
    b1 = jnp.zeros((1, dim), jnp.float32)
    g2 = jnp.ones((1, dim), jnp.float32)
    b2 = jnp.zeros((1, dim), jnp.float32)
    w1 = jax.random.uniform(k1, (dim, hidden), jnp.float32, -1.0, 1.0) / jnp.sqrt(dim)
    c1 = jnp.zeros((1, hidden), jnp.float32)
    w2 = jax.random.uniform(k2, (hidden, dim), jnp.float32, -1.0, 1.0) / jnp.sqrt(hidden)
    c2 = jnp.zeros((1, dim), jnp.float32)
    return dict(g1=g1, b1=b1, g2=g2, b2=b2, w1=w1, c1=c1, w2=w2, c2=c2)


class MCSwinlayerPallas:
    """JAX/Pallas counterpart of MCSwinlayer."""

    def __init__(self, dim, depth, num_heads, downsample=False, mlp_ratio=4,
                 key=None, mm_dtype=jnp.bfloat16):
        if downsample:
            # TODO(synk): ConvDownsampler is not defined in the reference source;
            # only the downsample=False (nn.Identity) path is implemented.
            raise NotImplementedError("ConvDownsampler not provided in reference")
        self.dim = dim
        self.depth = depth
        self.num_heads = num_heads
        self.downsample = downsample
        self.mm_dtype = mm_dtype
        self.pw_dtype = _pointwise_dtype()

        key = jax.random.PRNGKey(0) if key is None else key
        self.block_params = [init_block_params(k, dim, mlp_ratio)
                             for k in jax.random.split(key, depth)]
        # Pre-pad / pre-cast once at init: no per-call HBM prep work.
        self.padded_params = [_pad_block_params(p, mm_dtype)
                              for p in self.block_params]

        @functools.partial(jax.jit, static_argnums=(2,))
        def _run(x, padded, single_buffer):
            for pp in padded:
                x = mcswin_block_apply(x, pp, mm_dtype=self.mm_dtype,
                                       pw_dtype=self.pw_dtype,
                                       single_buffer=single_buffer)
            return x

        self._run = _run

    def forward(self, x, N):
        # Exact reproduction of MCSwinlayer.forward: downsample_layer is
        # nn.Identity here and self.blocks is never invoked, so this is a pure
        # pass-through (no kernel launched).
        return x, N

    def run_blocks(self, x):
        # NOT part of MCSwinlayer.forward (the reference never calls
        # self.blocks); provided to exercise the fused block Pallas kernel.
        # TODO(synk): MCSwinTransformerBlock.forward reads undefined `self.L`
        # (AttributeError in PyTorch) and never calls self.attention; that
        # unused/broken portion is omitted here.
        try:
            return self._run(x, self.padded_params, True)
        except Exception:
            # Fallback if this jax build rejects pipeline_mode=pl.Buffered(1).
            return self._run(x, self.padded_params, False)


if __name__ == "__main__":
    key = jax.random.PRNGKey(0)
    kx, kp = jax.random.split(key)

    B, N, C = 2, 8, 32
    x = jax.random.normal(kx, (B, N, C), jnp.float32)

    layer = MCSwinlayerPallas(dim=C, depth=2, num_heads=4, downsample=False, key=kp)

    # Faithful MCSwinlayer.forward path (downsample=False -> Identity).
    out_x, out_N = layer.forward(x, N)
    out_x = jax.block_until_ready(out_x)
    assert out_N == N
    assert out_x.shape == (B, N, C) and out_x.dtype == x.dtype
    assert bool(jnp.allclose(out_x, x)), "identity pass-through mismatch"

    # Exercise the fused transformer-block kernel and check against a pure-JAX
    # f32 reference.  bf16 MXU operands (and bf16 GELU on v6e/v7x) relax
    # accuracy -> loose tolerance, intentional and documented.
    y = jax.block_until_ready(layer.run_blocks(x))
    y_ref = x
    for p in layer.block_params:
        y_ref = _block_ref(y_ref, p)
    assert y.shape == (B, N, C) and bool(jnp.all(jnp.isfinite(y)))
    max_err = float(jnp.max(jnp.abs(y.astype(jnp.float32) - y_ref.astype(jnp.float32))))
    assert max_err < 1.5e-1, f"kernel vs reference max abs err {max_err}"

    print("KERNEL_OK")
</pallas_src>

<mosaic_0001>
module attributes {stable_mosaic.version = 11 : i64} {
  func.func @kernel(%arg0: i32, %arg1: i32, %arg2: memref<8x128xf32, #tpu.memory_space<vmem>>, %arg3: memref<8x128xf32, #tpu.memory_space<vmem>>, %arg4: memref<128x128xbf16, #tpu.memory_space<vmem>>, %arg5: memref<1x128xf32, #tpu.memory_space<vmem>>, %arg6: memref<128x128xbf16, #tpu.memory_space<vmem>>, %arg7: memref<8x128xf32, #tpu.memory_space<vmem>>, %arg8: memref<8x128xf32, #tpu.memory_space<vmem>>, %arg9: memref<8x128xbf16, #tpu.memory_space<vmem>>) attributes {dimension_semantics = [#tpu.dimension_semantics<parallel>, #tpu.dimension_semantics<arbitrary>], iteration_bounds = array<i64: 2, 1>, scalar_prefetch = 0 : i64, scratch_operands = 2 : i64, tpu.core_type = #tpu.core_type<tc>, window_params = [{transform_indices = @transform_0, window_bounds = array<i64: 8, 128>}, {pipeline_mode = #tpu.pipeline_mode<synchronous>, transform_indices = @transform_1, window_bounds = array<i64: 8, 128>}, {pipeline_mode = #tpu.pipeline_mode<synchronous>, transform_indices = @transform_2, window_bounds = array<i64: 128, 128>}, {pipeline_mode = #tpu.pipeline_mode<synchronous>, transform_indices = @transform_3, window_bounds = array<i64: 1, 128>}, {pipeline_mode = #tpu.pipeline_mode<synchronous>, transform_indices = @transform_4, window_bounds = array<i64: 128, 128>}, {transform_indices = @transform_5, window_bounds = array<i64: 8, 128>}]} {
    %c0_i32 = arith.constant 0 : i32
    %0 = arith.cmpi eq, %arg1, %c0_i32 : i32
    %1 = arith.extui %0 : i1 to i32
    %c0_i32_0 = arith.constant 0 : i32
    %2 = arith.cmpi ne, %1, %c0_i32_0 : i32
    scf.if %2 {
      %c0_19 = arith.constant 0 : index
      %c0_20 = arith.constant 0 : index
      %31 = vector.load %arg2[%c0_19, %c0_20] : memref<8x128xf32, #tpu.memory_space<vmem>>, vector<8x128xf32>
      %c0_21 = arith.constant 0 : index
      %c0_22 = arith.constant 0 : index
      %32 = vector.load %arg3[%c0_21, %c0_22] : memref<8x128xf32, #tpu.memory_space<vmem>>, vector<8x128xf32>
      %33 = tpu.iota {dimensions = array<i32: 1>} : vector<8x128xi32>
      %c32_i32 = arith.constant 32 : i32
      %34 = vector.broadcast %c32_i32 : i32 to vector<8x128xi32>
      %35 = arith.cmpi slt, %33, %34 : vector<8x128xi32>
      %36 = vector.extract_strided_slice %32 {offsets = [0, 0], sizes = [1, 128], strides = [1, 1]} : vector<8x128xf32> to vector<1x128xf32>
      %37 = vector.extract_strided_slice %32 {offsets = [1, 0], sizes = [1, 128], strides = [1, 1]} : vector<8x128xf32> to vector<1x128xf32>
      %cst_23 = arith.constant dense<0.000000e+00> : vector<8xf32>
      %38 = vector.multi_reduction <add>, %31, %cst_23 [1] : vector<8x128xf32> to vector<8xf32>
      %39 = vector.shape_cast %38 : vector<8xf32> to vector<8x1xf32>
      %cst_24 = arith.constant 3.125000e-02 : f32
      %40 = vector.broadcast %cst_24 : f32 to vector<8x1xf32>
      %41 = arith.mulf %39, %40 : vector<8x1xf32>
      %42 = vector.broadcast %41 : vector<8x1xf32> to vector<8x128xf32>
      %43 = arith.subf %31, %42 : vector<8x128xf32>
      %cst_25 = arith.constant 0.000000e+00 : f32
      %44 = vector.broadcast %cst_25 : f32 to vector<8x128xf32>
      %45 = arith.select %35, %43, %44 : vector<8x128xi1>, vector<8x128xf32>
      %46 = arith.mulf %45, %45 : vector<8x128xf32>
      %cst_26 = arith.constant dense<0.000000e+00> : vector<8xf32>
      %47 = vector.multi_reduction <add>, %46, %cst_26 [1] : vector<8x128xf32> to vector<8xf32>
      %48 = vector.shape_cast %47 : vector<8xf32> to vector<8x1xf32>
      %cst_27 = arith.constant 3.125000e-02 : f32
      %49 = vector.broadcast %cst_27 : f32 to vector<8x1xf32>
      %50 = arith.mulf %48, %49 : vector<8x1xf32>
      %cst_28 = arith.constant 9.99999974E-6 : f32
      %51 = vector.broadcast %cst_28 : f32 to vector<8x1xf32>
      %52 = arith.addf %50, %51 : vector<8x1xf32>
      %53 = math.rsqrt %52 : vector<8x1xf32>
      %54 = vector.broadcast %53 : vector<8x1xf32> to vector<8x128xf32>
      %55 = arith.mulf %45, %54 : vector<8x128xf32>
      %56 = vector.broadcast %36 : vector<1x128xf32> to vector<8x128xf32>
      %57 = arith.mulf %55, %56 : vector<8x128xf32>
      %58 = vector.broadcast %37 : vector<1x128xf32> to vector<8x128xf32>
      %59 = arith.addf %57, %58 : vector<8x128xf32>
      %60 = arith.addf %31, %59 : vector<8x128xf32>
      %c0_29 = arith.constant 0 : index
      %c0_30 = arith.constant 0 : index
      %61 = vector.load %arg8[%c0_29, %c0_30] : memref<8x128xf32, #tpu.memory_space<vmem>>, vector<8x128xf32>
      tpu.vector_store %arg8[%c0_29, %c0_30], %60 {strides = array<i32>} : memref<8x128xf32, #tpu.memory_space<vmem>>, vector<8x128xf32>,
      %62 = vector.extract_strided_slice %32 {offsets = [2, 0], sizes = [1, 128], strides = [1, 1]} : vector<8x128xf32> to vector<1x128xf32>
      %63 = vector.extract_strided_slice %32 {offsets = [3, 0], sizes = [1, 128], strides = [1, 1]} : vector<8x128xf32> to vector<1x128xf32>
      %cst_31 = arith.constant dense<0.000000e+00> : vector<8xf32>
      %64 = vector.multi_reduction <add>, %60, %cst_31 [1] : vector<8x128xf32> to vector<8xf32>
      %65 = vector.shape_cast %64 : vector<8xf32> to vector<8x1xf32>
      %cst_32 = arith.constant 3.125000e-02 : f32
      %66 = vector.broadcast %cst_32 : f32 to vector<8x1xf32>
      %67 = arith.mulf %65, %66 : vector<8x1xf32>
      %68 = vector.broadcast %67 : vector<8x1xf32> to vector<8x128xf32>
      %69 = arith.subf %60, %68 : vector<8x128xf32>
      %cst_33 = arith.constant 0.000000e+00 : f32
      %70 = vector.broadcast %cst_33 : f32 to vector<8x128xf32>
      %71 = arith.select %35, %69, %70 : vector<8x128xi1>, vector<8x128xf32>
      %72 = arith.mulf %71, %71 : vector<8x128xf32>
      %cst_34 = arith.constant dense<0.000000e+00> : vector<8xf32>
      %73 = vector.multi_reduction <add>, %72, %cst_34 [1] : vector<8x128xf32> to vector<8xf32>
      %74 = vector.shape_cast %73 : vector<8xf32> to vector<8x1xf32>
      %cst_35 = arith.constant 3.125000e-02 : f32
      %75 = vector.broadcast %cst_35 : f32 to vector<8x1xf32>
      %76 = arith.mulf %74, %75 : vector<8x1xf32>
      %cst_36 = arith.constant 9.99999974E-6 : f32
      %77 = vector.broadcast %cst_36 : f32 to vector<8x1xf32>
      %78 = arith.addf %76, %77 : vector<8x1xf32>
      %79 = math.rsqrt %78 : vector<8x1xf32>
      %80 = vector.broadcast %79 : vector<8x1xf32> to vector<8x128xf32>
      %81 = arith.mulf %71, %80 : vector<8x128xf32>
      %82 = vector.broadcast %62 : vector<1x128xf32> to vector<8x128xf32>
      %83 = arith.mulf %81, %82 : vector<8x128xf32>
      %84 = vector.broadcast %63 : vector<1x128xf32> to vector<8x128xf32>
      %85 = arith.addf %83, %84 : vector<8x128xf32>
      %86 = arith.truncf %85 : vector<8x128xf32> to vector<8x128xbf16>
      %c0_37 = arith.constant 0 : index
      %c0_38 = arith.constant 0 : index
      %87 = vector.load %arg9[%c0_37, %c0_38] : memref<8x128xbf16, #tpu.memory_space<vmem>>, vector<8x128xbf16>
      tpu.vector_store %arg9[%c0_37, %c0_38], %86 {strides = array<i32>} : memref<8x128xbf16, #tpu.memory_space<vmem>>, vector<8x128xbf16>,
    } else {
    }
    %c0 = arith.constant 0 : index
    %c0_1 = arith.constant 0 : index
    %3 = vector.load %arg9[%c0, %c0_1] : memref<8x128xbf16, #tpu.memory_space<vmem>>, vector<8x128xbf16>
    %c0_2 = arith.constant 0 : index
    %c0_3 = arith.constant 0 : index
    %4 = vector.load %arg4[%c0_2, %c0_3] : memref<128x128xbf16, #tpu.memory_space<vmem>>, vector<128x128xbf16>
    %cst = arith.constant dense<0.000000e+00> : vector<8x128xf32>
    %5 = tpu.matmul %3, %4, %cst {dimension_numbers = #tpu.dot_dimension_numbers<[1], [0], [0], [1], [0, 0, 1, 1], [], []>} : vector<8x128xbf16>, vector<128x128xbf16>, vector<8x128xf32> -> vector<8x128xf32>
    %c0_4 = arith.constant 0 : index
    %c0_5 = arith.constant 0 : index
    %6 = vector.load %arg5[%c0_4, %c0_5] : memref<1x128xf32, #tpu.memory_space<vmem>>, vector<1x128xf32>
    %7 = vector.broadcast %6 : vector<1x128xf32> to vector<8x128xf32>
    %8 = arith.addf %5, %7 : vector<8x128xf32>
    %9 = arith.truncf %8 : vector<8x128xf32> to vector<8x128xbf16>
    %cst_6 = arith.constant 5.000000e-01 : bf16
    %10 = vector.broadcast %cst_6 : bf16 to vector<8x128xbf16>
    %11 = arith.mulf %10, %9 : vector<8x128xbf16>
    %cst_7 = arith.constant 4.467770e-02 : bf16
    %12 = vector.broadcast %cst_7 : bf16 to vector<8x128xbf16>
    %13 = arith.mulf %12, %9 : vector<8x128xbf16>
    %14 = arith.mulf %13, %9 : vector<8x128xbf16>
    %15 = arith.mulf %14, %9 : vector<8x128xbf16>
    %16 = arith.addf %9, %15 : vector<8x128xbf16>
    %cst_8 = arith.constant 7.968750e-01 : bf16
    %17 = vector.broadcast %cst_8 : bf16 to vector<8x128xbf16>
    %18 = arith.mulf %17, %16 : vector<8x128xbf16>
    %19 = math.tanh %18 : vector<8x128xbf16>
    %cst_9 = arith.constant 1.000000e+00 : bf16
    %20 = vector.broadcast %cst_9 : bf16 to vector<8x128xbf16>
    %21 = arith.addf %20, %19 : vector<8x128xbf16>
    %22 = arith.mulf %11, %21 : vector<8x128xbf16>
    %c0_10 = arith.constant 0 : index
    %c0_11 = arith.constant 0 : index
    %23 = vector.load %arg8[%c0_10, %c0_11] : memref<8x128xf32, #tpu.memory_space<vmem>>, vector<8x128xf32>
    %c0_12 = arith.constant 0 : index
    %c0_13 = arith.constant 0 : index
    %24 = vector.load %arg6[%c0_12, %c0_13] : memref<128x128xbf16, #tpu.memory_space<vmem>>, vector<128x128xbf16>
    %cst_14 = arith.constant dense<0.000000e+00> : vector<8x128xf32>
    %25 = tpu.matmul %22, %24, %cst_14 {dimension_numbers = #tpu.dot_dimension_numbers<[1], [0], [0], [1], [0, 0, 1, 1], [], []>} : vector<8x128xbf16>, vector<128x128xbf16>, vector<8x128xf32> -> vector<8x128xf32>
    %26 = arith.addf %23, %25 : vector<8x128xf32>
    %c0_15 = arith.constant 0 : index
    %c0_16 = arith.constant 0 : index
    %27 = vector.load %arg8[%c0_15, %c0_16] : memref<8x128xf32, #tpu.memory_space<vmem>>, vector<8x128xf32>
    tpu.vector_store %arg8[%c0_15, %c0_16], %26 {strides = array<i32>} : memref<8x128xf32, #tpu.memory_space<vmem>>, vector<8x128xf32>,
    %c0_i32_17 = arith.constant 0 : i32
    %28 = arith.cmpi eq, %arg1, %c0_i32_17 : i32
    %29 = arith.extui %28 : i1 to i32
    %c0_i32_18 = arith.constant 0 : i32
    %30 = arith.cmpi ne, %29, %c0_i32_18 : i32
    scf.if %30 {
      %c0_19 = arith.constant 0 : index
      %c0_20 = arith.constant 0 : index
      %31 = vector.load %arg8[%c0_19, %c0_20] : memref<8x128xf32, #tpu.memory_space<vmem>>, vector<8x128xf32>
      %c4 = arith.constant 4 : index
      %c0_21 = arith.constant 0 : index
      %32 = vector.load %arg3[%c4, %c0_21] : memref<8x128xf32, #tpu.memory_space<vmem>>, vector<1x128xf32>
      %33 = vector.broadcast %32 : vector<1x128xf32> to vector<8x128xf32>
      %34 = arith.addf %31, %33 : vector<8x128xf32>
      %c0_22 = arith.constant 0 : index
      %c0_23 = arith.constant 0 : index
      %35 = vector.load %arg7[%c0_22, %c0_23] : memref<8x128xf32, #tpu.memory_space<vmem>>, vector<8x128xf32>
      tpu.vector_store %arg7[%c0_22, %c0_23], %34 {strides = array<i32>} : memref<8x128xf32, #tpu.memory_space<vmem>>, vector<8x128xf32>,
    } else {
    }
    return
  }
  func.func @transform_0(%arg0: i32, %arg1: i32) -> (i32, i32) {
    %c0_i32 = arith.constant 0 : i32
    %c0_i32_0 = arith.constant 0 : i32
    return %arg0, %c0_i32 : i32, i32
  }
  func.func @transform_1(%arg0: i32, %arg1: i32) -> (i32, i32) {
    %c0_i32 = arith.constant 0 : i32
    %c0_i32_0 = arith.constant 0 : i32
    %c0_i32_1 = arith.constant 0 : i32
    return %c0_i32, %c0_i32_0 : i32, i32
  }
  func.func @transform_2(%arg0: i32, %arg1: i32) -> (i32, i32) {
    %c0_i32 = arith.constant 0 : i32
    %c0_i32_0 = arith.constant 0 : i32
    return %c0_i32, %arg1 : i32, i32
  }
  func.func @transform_3(%arg0: i32, %arg1: i32) -> (i32, i32) {
    %c0_i32 = arith.constant 0 : i32
    %c0_i32_0 = arith.constant 0 : i32
    return %c0_i32, %arg1 : i32, i32
  }
  func.func @transform_4(%arg0: i32, %arg1: i32) -> (i32, i32) {
    %c0_i32 = arith.constant 0 : i32
    %c0_i32_0 = arith.constant 0 : i32
    return %arg1, %c0_i32 : i32, i32
  }
  func.func @transform_5(%arg0: i32, %arg1: i32) -> (i32, i32) {
    %c0_i32 = arith.constant 0 : i32
    %c0_i32_0 = arith.constant 0 : i32
    return %arg0, %c0_i32 : i32, i32
  }
}

module attributes {stable_mosaic.version = 11 : i64} {
  func.func @kernel(%arg0: i32, %arg1: i32, %arg2: memref<8x128xf32, #tpu.memory_space<vmem>>, %arg3: memref<8x128xf32, #tpu.memory_space<vmem>>, %arg4: memref<128x128xbf16, #tpu.memory_space<vmem>>, %arg5: memref<1x128xf32, #tpu.memory_space<vmem>>, %arg6: memref<128x128xbf16, #tpu.memory_space<vmem>>, %arg7: memref<8x128xf32, #tpu.memory_space<vmem>>, %arg8: memref<8x128xf32, #tpu.memory_space<vmem>>, %arg9: memref<8x128xbf16, #tpu.memory_space<vmem>>) attributes {dimension_semantics = [#tpu.dimension_semantics<parallel>, #tpu.dimension_semantics<arbitrary>], iteration_bounds = array<i64: 2, 1>, scalar_prefetch = 0 : i64, scratch_operands = 2 : i64, tpu.core_type = #tpu.core_type<tc>, window_params = [{transform_indices = @transform_0, window_bounds = array<i64: 8, 128>}, {pipeline_mode = #tpu.pipeline_mode<synchronous>, transform_indices = @transform_1, window_bounds = array<i64: 8, 128>}, {pipeline_mode = #tpu.pipeline_mode<synchronous>, transform_indices = @transform_2, window_bounds = array<i64: 128, 128>}, {pipeline_mode = #tpu.pipeline_mode<synchronous>, transform_indices = @transform_3, window_bounds = array<i64: 1, 128>}, {pipeline_mode = #tpu.pipeline_mode<synchronous>, transform_indices = @transform_4, window_bounds = array<i64: 128, 128>}, {transform_indices = @transform_5, window_bounds = array<i64: 8, 128>}]} {
    %c0_i32 = arith.constant 0 : i32
    %0 = arith.cmpi eq, %arg1, %c0_i32 : i32
    %1 = arith.extui %0 : i1 to i32
    %c0_i32_0 = arith.constant 0 : i32
    %2 = arith.cmpi ne, %1, %c0_i32_0 : i32
    scf.if %2 {
      %c0_19 = arith.constant 0 : index
      %c0_20 = arith.constant 0 : index
      %31 = vector.load %arg2[%c0_19, %c0_20] : memref<8x128xf32, #tpu.memory_space<vmem>>, vector<8x128xf32>
      %c0_21 = arith.constant 0 : index
      %c0_22 = arith.constant 0 : index
      %32 = vector.load %arg3[%c0_21, %c0_22] : memref<8x128xf32, #tpu.memory_space<vmem>>, vector<8x128xf32>
      %33 = tpu.iota {dimensions = array<i32: 1>} : vector<8x128xi32>
      %c32_i32 = arith.constant 32 : i32
      %34 = vector.broadcast %c32_i32 : i32 to vector<8x128xi32>
      %35 = arith.cmpi slt, %33, %34 : vector<8x128xi32>
      %36 = vector.extract_strided_slice %32 {offsets = [0, 0], sizes = [1, 128], strides = [1, 1]} : vector<8x128xf32> to vector<1x128xf32>
      %37 = vector.extract_strided_slice %32 {offsets = [1, 0], sizes = [1, 128], strides = [1, 1]} : vector<8x128xf32> to vector<1x128xf32>
      %cst_23 = arith.constant dense<0.000000e+00> : vector<8xf32>
      %38 = vector.multi_reduction <add>, %31, %cst_23 [1] : vector<8x128xf32> to vector<8xf32>
      %39 = vector.shape_cast %38 : vector<8xf32> to vector<8x1xf32>
      %cst_24 = arith.constant 3.125000e-02 : f32
      %40 = vector.broadcast %cst_24 : f32 to vector<8x1xf32>
      %41 = arith.mulf %39, %40 : vector<8x1xf32>
      %42 = vector.broadcast %41 : vector<8x1xf32> to vector<8x128xf32>
      %43 = arith.subf %31, %42 : vector<8x128xf32>
      %cst_25 = arith.constant 0.000000e+00 : f32
      %44 = vector.broadcast %cst_25 : f32 to vector<8x128xf32>
      %45 = arith.select %35, %43, %44 : vector<8x128xi1>, vector<8x128xf32>
      %46 = arith.mulf %45, %45 : vector<8x128xf32>
      %cst_26 = arith.constant dense<0.000000e+00> : vector<8xf32>
      %47 = vector.multi_reduction <add>, %46, %cst_26 [1] : vector<8x128xf32> to vector<8xf32>
      %48 = vector.shape_cast %47 : vector<8xf32> to vector<8x1xf32>
      %cst_27 = arith.constant 3.125000e-02 : f32
      %49 = vector.broadcast %cst_27 : f32 to vector<8x1xf32>
      %50 = arith.mulf %48, %49 : vector<8x1xf32>
      %cst_28 = arith.constant 9.99999974E-6 : f32
      %51 = vector.broadcast %cst_28 : f32 to vector<8x1xf32>
      %52 = arith.addf %50, %51 : vector<8x1xf32>
      %53 = math.rsqrt %52 : vector<8x1xf32>
      %54 = vector.broadcast %53 : vector<8x1xf32> to vector<8x128xf32>
      %55 = arith.mulf %45, %54 : vector<8x128xf32>
      %56 = vector.broadcast %36 : vector<1x128xf32> to vector<8x128xf32>
      %57 = arith.mulf %55, %56 : vector<8x128xf32>
      %58 = vector.broadcast %37 : vector<1x128xf32> to vector<8x128xf32>
      %59 = arith.addf %57, %58 : vector<8x128xf32>
      %60 = arith.addf %31, %59 : vector<8x128xf32>
      %c0_29 = arith.constant 0 : index
      %c0_30 = arith.constant 0 : index
      %61 = vector.load %arg8[%c0_29, %c0_30] : memref<8x128xf32, #tpu.memory_space<vmem>>, vector<8x128xf32>
      tpu.vector_store %arg8[%c0_29, %c0_30], %60 {strides = array<i32>} : memref<8x128xf32, #tpu.memory_space<vmem>>, vector<8x128xf32>,
      %62 = vector.extract_strided_slice %32 {offsets = [2, 0], sizes = [1, 128], strides = [1, 1]} : vector<8x128xf32> to vector<1x128xf32>
      %63 = vector.extract_strided_slice %32 {offsets = [3, 0], sizes = [1, 128], strides = [1, 1]} : vector<8x128xf32> to vector<1x128xf32>
      %cst_31 = arith.constant dense<0.000000e+00> : vector<8xf32>
      %64 = vector.multi_reduction <add>, %60, %cst_31 [1] : vector<8x128xf32> to vector<8xf32>
      %65 = vector.shape_cast %64 : vector<8xf32> to vector<8x1xf32>
      %cst_32 = arith.constant 3.125000e-02 : f32
      %66 = vector.broadcast %cst_32 : f32 to vector<8x1xf32>
      %67 = arith.mulf %65, %66 : vector<8x1xf32>
      %68 = vector.broadcast %67 : vector<8x1xf32> to vector<8x128xf32>
      %69 = arith.subf %60, %68 : vector<8x128xf32>
      %cst_33 = arith.constant 0.000000e+00 : f32
      %70 = vector.broadcast %cst_33 : f32 to vector<8x128xf32>
      %71 = arith.select %35, %69, %70 : vector<8x128xi1>, vector<8x128xf32>
      %72 = arith.mulf %71, %71 : vector<8x128xf32>
      %cst_34 = arith.constant dense<0.000000e+00> : vector<8xf32>
      %73 = vector.multi_reduction <add>, %72, %cst_34 [1] : vector<8x128xf32> to vector<8xf32>
      %74 = vector.shape_cast %73 : vector<8xf32> to vector<8x1xf32>
      %cst_35 = arith.constant 3.125000e-02 : f32
      %75 = vector.broadcast %cst_35 : f32 to vector<8x1xf32>
      %76 = arith.mulf %74, %75 : vector<8x1xf32>
      %cst_36 = arith.constant 9.99999974E-6 : f32
      %77 = vector.broadcast %cst_36 : f32 to vector<8x1xf32>
      %78 = arith.addf %76, %77 : vector<8x1xf32>
      %79 = math.rsqrt %78 : vector<8x1xf32>
      %80 = vector.broadcast %79 : vector<8x1xf32> to vector<8x128xf32>
      %81 = arith.mulf %71, %80 : vector<8x128xf32>
      %82 = vector.broadcast %62 : vector<1x128xf32> to vector<8x128xf32>
      %83 = arith.mulf %81, %82 : vector<8x128xf32>
      %84 = vector.broadcast %63 : vector<1x128xf32> to vector<8x128xf32>
      %85 = arith.addf %83, %84 : vector<8x128xf32>
      %86 = arith.truncf %85 : vector<8x128xf32> to vector<8x128xbf16>
      %c0_37 = arith.constant 0 : index
      %c0_38 = arith.constant 0 : index
      %87 = vector.load %arg9[%c0_37, %c0_38] : memref<8x128xbf16, #tpu.memory_space<vmem>>, vector<8x128xbf16>
      tpu.vector_store %arg9[%c0_37, %c0_38], %86 {strides = array<i32>} : memref<8x128xbf16, #tpu.memory_space<vmem>>, vector<8x128xbf16>,
    } else {
    }
    %c0 = arith.constant 0 : index
    %c0_1 = arith.constant 0 : index
    %3 = vector.load %arg9[%c0, %c0_1] : memref<8x128xbf16, #tpu.memory_space<vmem>>, vector<8x128xbf16>
    %c0_2 = arith.constant 0 : index
    %c0_3 = arith.constant 0 : index
    %4 = vector.load %arg4[%c0_2, %c0_3] : memref<128x128xbf16, #tpu.memory_space<vmem>>, vector<128x128xbf16>
    %cst = arith.constant dense<0.000000e+00> : vector<8x128xf32>
    %5 = tpu.matmul %3, %4, %cst {dimension_numbers = #tpu.dot_dimension_numbers<[1], [0], [0], [1], [0, 0, 1, 1], [], []>} : vector<8x128xbf16>, vector<128x128xbf16>, vector<8x128xf32> -> vector<8x128xf32>
    %c0_4 = arith.constant 0 : index
    %c0_5 = arith.constant 0 : index
    %6 = vector.load %arg5[%c0_4, %c0_5] : memref<1x128xf32, #tpu.memory_space<vmem>>, vector<1x128xf32>
    %7 = vector.broadcast %6 : vector<1x128xf32> to vector<8x128xf32>
    %8 = arith.addf %5, %7 : vector<8x128xf32>
    %9 = arith.truncf %8 : vector<8x128xf32> to vector<8x128xbf16>
    %cst_6 = arith.constant 5.000000e-01 : bf16
    %10 = vector.broadcast %cst_6 : bf16 to vector<8x128xbf16>
    %11 = arith.mulf %10, %9 : vector<8x128xbf16>
    %cst_7 = arith.constant 4.467770e-02 : bf16
    %12 = vector.broadcast %cst_7 : bf16 to vector<8x128xbf16>
    %13 = arith.mulf %12, %9 : vector<8x128xbf16>
    %14 = arith.mulf %13, %9 : vector<8x128xbf16>
    %15 = arith.mulf %14, %9 : vector<8x128xbf16>
    %16 = arith.addf %9, %15 : vector<8x128xbf16>
    %cst_8 = arith.constant 7.968750e-01 : bf16
    %17 = vector.broadcast %cst_8 : bf16 to vector<8x128xbf16>
    %18 = arith.mulf %17, %16 : vector<8x128xbf16>
    %19 = math.tanh %18 : vector<8x128xbf16>
    %cst_9 = arith.constant 1.000000e+00 : bf16
    %20 = vector.broadcast %cst_9 : bf16 to vector<8x128xbf16>
    %21 = arith.addf %20, %19 : vector<8x128xbf16>
    %22 = arith.mulf %11, %21 : vector<8x128xbf16>
    %c0_10 = arith.constant 0 : index
    %c0_11 = arith.constant 0 : index
    %23 = vector.load %arg8[%c0_10, %c0_11] : memref<8x128xf32, #tpu.memory_space<vmem>>, vector<8x128xf32>
    %c0_12 = arith.constant 0 : index
    %c0_13 = arith.constant 0 : index
    %24 = vector.load %arg6[%c0_12, %c0_13] : memref<128x128xbf16, #tpu.memory_space<vmem>>, vector<128x128xbf16>
    %cst_14 = arith.constant dense<0.000000e+00> : vector<8x128xf32>
    %25 = tpu.matmul %22, %24, %cst_14 {dimension_numbers = #tpu.dot_dimension_numbers<[1], [0], [0], [1], [0, 0, 1, 1], [], []>} : vector<8x128xbf16>, vector<128x128xbf16>, vector<8x128xf32> -> vector<8x128xf32>
    %26 = arith.addf %23, %25 : vector<8x128xf32>
    %c0_15 = arith.constant 0 : index
    %c0_16 = arith.constant 0 : index
    %27 = vector.load %arg8[%c0_15, %c0_16] : memref<8x128xf32, #tpu.memory_space<vmem>>, vector<8x128xf32>
    tpu.vector_store %arg8[%c0_15, %c0_16], %26 {strides = array<i32>} : memref<8x128xf32, #tpu.memory_space<vmem>>, vector<8x128xf32>,
    %c0_i32_17 = arith.constant 0 : i32
    %28 = arith.cmpi eq, %arg1, %c0_i32_17 : i32
    %29 = arith.extui %28 : i1 to i32
    %c0_i32_18 = arith.constant 0 : i32
    %30 = arith.cmpi ne, %29, %c0_i32_18 : i32
    scf.if %30 {
      %c0_19 = arith.constant 0 : index
      %c0_20 = arith.constant 0 : index
      %31 = vector.load %arg8[%c0_19, %c0_20] : memref<8x128xf32, #tpu.memory_space<vmem>>, vector<8x128xf32>
      %c4 = arith.constant 4 : index
      %c0_21 = arith.constant 0 : index
      %32 = vector.load %arg3[%c4, %c0_21] : memref<8x128xf32, #tpu.memory_space<vmem>>, vector<1x128xf32>
      %33 = vector.broadcast %32 : vector<1x128xf32> to vector<8x128xf32>
      %34 = arith.addf %31, %33 : vector<8x128xf32>
      %c0_22 = arith.constant 0 : index
      %c0_23 = arith.constant 0 : index
      %35 = vector.load %arg7[%c0_22, %c0_23] : memref<8x128xf32, #tpu.memory_space<vmem>>, vector<8x128xf32>
      tpu.vector_store %arg7[%c0_22, %c0_23], %34 {strides = array<i32>} : memref<8x128xf32, #tpu.memory_space<vmem>>, vector<8x128xf32>,
    } else {
    }
    return
  }
  func.func @transform_0(%arg0: i32, %arg1: i32) -> (i32, i32) {
    %c0_i32 = arith.constant 0 : i32
    %c0_i32_0 = arith.constant 0 : i32
    return %arg0, %c0_i32 : i32, i32
  }
  func.func @transform_1(%arg0: i32, %arg1: i32) -> (i32, i32) {
    %c0_i32 = arith.constant 0 : i32
    %c0_i32_0 = arith.constant 0 : i32
    %c0_i32_1 = arith.constant 0 : i32
    return %c0_i32, %c0_i32_0 : i32, i32
  }
  func.func @transform_2(%arg0: i32, %arg1: i32) -> (i32, i32) {
    %c0_i32 = arith.constant 0 : i32
    %c0_i32_0 = arith.constant 0 : i32
    return %c0_i32, %arg1 : i32, i32
  }
  func.func @transform_3(%arg0: i32, %arg1: i32) -> (i32, i32) {
    %c0_i32 = arith.constant 0 : i32
    %c0_i32_0 = arith.constant 0 : i32
    return %c0_i32, %arg1 : i32, i32
  }
  func.func @transform_4(%arg0: i32, %arg1: i32) -> (i32, i32) {
    %c0_i32 = arith.constant 0 : i32
    %c0_i32_0 = arith.constant 0 : i32
    return %arg1, %c0_i32 : i32, i32
  }
  func.func @transform_5(%arg0: i32, %arg1: i32) -> (i32, i32) {
    %c0_i32 = arith.constant 0 : i32
    %c0_i32_0 = arith.constant 0 : i32
    return %arg0, %c0_i32 : i32, i32
  }
}

module attributes {stable_mosaic.version = 11 : i64} {
  func.func @kernel(%arg0: i32, %arg1: i32, %arg2: memref<8x128xf32, #tpu.memory_space<vmem>>, %arg3: memref<8x128xf32, #tpu.memory_space<vmem>>, %arg4: memref<128x128xbf16, #tpu.memory_space<vmem>>, %arg5: memref<1x128xf32, #tpu.memory_space<vmem>>, %arg6: memref<128x128xbf16, #tpu.memory_space<vmem>>, %arg7: memref<8x128xf32, #tpu.memory_space<vmem>>, %arg8: memref<8x128xf32, #tpu.memory_space<vmem>>, %arg9: memref<8x128xbf16, #tpu.memory_space<vmem>>) attributes {dimension_semantics = [#tpu.dimension_semantics<parallel>, #tpu.dimension_semantics<arbitrary>], iteration_bounds = array<i64: 2, 1>, scalar_prefetch = 0 : i64, scratch_operands = 2 : i64, tpu.core_type = #tpu.core_type<tc>, window_params = [{transform_indices = @transform_0, window_bounds = array<i64: 8, 128>}, {pipeline_mode = #tpu.pipeline_mode<synchronous>, transform_indices = @transform_1, window_bounds = array<i64: 8, 128>}, {transform_indices = @transform_2, window_bounds = array<i64: 128, 128>}, {transform_indices = @transform_3, window_bounds = array<i64: 1, 128>}, {transform_indices = @transform_4, window_bounds = array<i64: 128, 128>}, {transform_indices = @transform_5, window_bounds = array<i64: 8, 128>}]} {
    %c0_i32 = arith.constant 0 : i32
    %0 = arith.cmpi eq, %arg1, %c0_i32 : i32
    %1 = arith.extui %0 : i1 to i32
    %c0_i32_0 = arith.constant 0 : i32
    %2 = arith.cmpi ne, %1, %c0_i32_0 : i32
    scf.if %2 {
      %c0_19 = arith.constant 0 : index
      %c0_20 = arith.constant 0 : index
      %31 = vector.load %arg2[%c0_19, %c0_20] : memref<8x128xf32, #tpu.memory_space<vmem>>, vector<8x128xf32>
      %c0_21 = arith.constant 0 : index
      %c0_22 = arith.constant 0 : index
      %32 = vector.load %arg3[%c0_21, %c0_22] : memref<8x128xf32, #tpu.memory_space<vmem>>, vector<8x128xf32>
      %33 = tpu.iota {dimensions = array<i32: 1>} : vector<8x128xi32>
      %c32_i32 = arith.constant 32 : i32
      %34 = vector.broadcast %c32_i32 : i32 to vector<8x128xi32>
      %35 = arith.cmpi slt, %33, %34 : vector<8x128xi32>
      %36 = vector.extract_strided_slice %32 {offsets = [0, 0], sizes = [1, 128], strides = [1, 1]} : vector<8x128xf32> to vector<1x128xf32>
      %37 = vector.extract_strided_slice %32 {offsets = [1, 0], sizes = [1, 128], strides = [1, 1]} : vector<8x128xf32> to vector<1x128xf32>
      %cst_23 = arith.constant dense<0.000000e+00> : vector<8xf32>
      %38 = vector.multi_reduction <add>, %31, %cst_23 [1] : vector<8x128xf32> to vector<8xf32>
      %39 = vector.shape_cast %38 : vector<8xf32> to vector<8x1xf32>
      %cst_24 = arith.constant 3.125000e-02 : f32
      %40 = vector.broadcast %cst_24 : f32 to vector<8x1xf32>
      %41 = arith.mulf %39, %40 : vector<8x1xf32>
      %42 = vector.broadcast %41 : vector<8x1xf32> to vector<8x128xf32>
      %43 = arith.subf %31, %42 : vector<8x128xf32>
      %cst_25 = arith.constant 0.000000e+00 : f32
      %44 = vector.broadcast %cst_25 : f32 to vector<8x128xf32>
      %45 = arith.select %35, %43, %44 : vector<8x128xi1>, vector<8x128xf32>
      %46 = arith.mulf %45, %45 : vector<8x128xf32>
      %cst_26 = arith.constant dense<0.000000e+00> : vector<8xf32>
      %47 = vector.multi_reduction <add>, %46, %cst_26 [1] : vector<8x128xf32> to vector<8xf32>
      %48 = vector.shape_cast %47 : vector<8xf32> to vector<8x1xf32>
      %cst_27 = arith.constant 3.125000e-02 : f32
      %49 = vector.broadcast %cst_27 : f32 to vector<8x1xf32>
      %50 = arith.mulf %48, %49 : vector<8x1xf32>
      %cst_28 = arith.constant 9.99999974E-6 : f32
      %51 = vector.broadcast %cst_28 : f32 to vector<8x1xf32>
      %52 = arith.addf %50, %51 : vector<8x1xf32>
      %53 = math.rsqrt %52 : vector<8x1xf32>
      %54 = vector.broadcast %53 : vector<8x1xf32> to vector<8x128xf32>
      %55 = arith.mulf %45, %54 : vector<8x128xf32>
      %56 = vector.broadcast %36 : vector<1x128xf32> to vector<8x128xf32>
      %57 = arith.mulf %55, %56 : vector<8x128xf32>
      %58 = vector.broadcast %37 : vector<1x128xf32> to vector<8x128xf32>
      %59 = arith.addf %57, %58 : vector<8x128xf32>
      %60 = arith.addf %31, %59 : vector<8x128xf32>
      %c0_29 = arith.constant 0 : index
      %c0_30 = arith.constant 0 : index
      %61 = vector.load %arg8[%c0_29, %c0_30] : memref<8x128xf32, #tpu.memory_space<vmem>>, vector<8x128xf32>
      tpu.vector_store %arg8[%c0_29, %c0_30], %60 {strides = array<i32>} : memref<8x128xf32, #tpu.memory_space<vmem>>, vector<8x128xf32>,
      %62 = vector.extract_strided_slice %32 {offsets = [2, 0], sizes = [1, 128], strides = [1, 1]} : vector<8x128xf32> to vector<1x128xf32>
      %63 = vector.extract_strided_slice %32 {offsets = [3, 0], sizes = [1, 128], strides = [1, 1]} : vector<8x128xf32> to vector<1x128xf32>
      %cst_31 = arith.constant dense<0.000000e+00> : vector<8xf32>
      %64 = vector.multi_reduction <add>, %60, %cst_31 [1] : vector<8x128xf32> to vector<8xf32>
      %65 = vector.shape_cast %64 : vector<8xf32> to vector<8x1xf32>
      %cst_32 = arith.constant 3.125000e-02 : f32
      %66 = vector.broadcast %cst_32 : f32 to vector<8x1xf32>
      %67 = arith.mulf %65, %66 : vector<8x1xf32>
      %68 = vector.broadcast %67 : vector<8x1xf32> to vector<8x128xf32>
      %69 = arith.subf %60, %68 : vector<8x128xf32>
      %cst_33 = arith.constant 0.000000e+00 : f32
      %70 = vector.broadcast %cst_33 : f32 to vector<8x128xf32>
      %71 = arith.select %35, %69, %70 : vector<8x128xi1>, vector<8x128xf32>
      %72 = arith.mulf %71, %71 : vector<8x128xf32>
      %cst_34 = arith.constant dense<0.000000e+00> : vector<8xf32>
      %73 = vector.multi_reduction <add>, %72, %cst_34 [1] : vector<8x128xf32> to vector<8xf32>
      %74 = vector.shape_cast %73 : vector<8xf32> to vector<8x1xf32>
      %cst_35 = arith.constant 3.125000e-02 : f32
      %75 = vector.broadcast %cst_35 : f32 to vector<8x1xf32>
      %76 = arith.mulf %74, %75 : vector<8x1xf32>
      %cst_36 = arith.constant 9.99999974E-6 : f32
      %77 = vector.broadcast %cst_36 : f32 to vector<8x1xf32>
      %78 = arith.addf %76, %77 : vector<8x1xf32>
      %79 = math.rsqrt %78 : vector<8x1xf32>
      %80 = vector.broadcast %79 : vector<8x1xf32> to vector<8x128xf32>
      %81 = arith.mulf %71, %80 : vector<8x128xf32>
      %82 = vector.broadcast %62 : vector<1x128xf32> to vector<8x128xf32>
      %83 = arith.mulf %81, %82 : vector<8x128xf32>
      %84 = vector.broadcast %63 : vector<1x128xf32> to vector<8x128xf32>
      %85 = arith.addf %83, %84 : vector<8x128xf32>
      %86 = arith.truncf %85 : vector<8x128xf32> to vector<8x128xbf16>
      %c0_37 = arith.constant 0 : index
      %c0_38 = arith.constant 0 : index
      %87 = vector.load %arg9[%c0_37, %c0_38] : memref<8x128xbf16, #tpu.memory_space<vmem>>, vector<8x128xbf16>
      tpu.vector_store %arg9[%c0_37, %c0_38], %86 {strides = array<i32>} : memref<8x128xbf16, #tpu.memory_space<vmem>>, vector<8x128xbf16>,
    } else {
    }
    %c0 = arith.constant 0 : index
    %c0_1 = arith.constant 0 : index
    %3 = vector.load %arg9[%c0, %c0_1] : memref<8x128xbf16, #tpu.memory_space<vmem>>, vector<8x128xbf16>
    %c0_2 = arith.constant 0 : index
    %c0_3 = arith.constant 0 : index
    %4 = vector.load %arg4[%c0_2, %c0_3] : memref<128x128xbf16, #tpu.memory_space<vmem>>, vector<128x128xbf16>
    %cst = arith.constant dense<0.000000e+00> : vector<8x128xf32>
    %5 = tpu.matmul %3, %4, %cst {dimension_numbers = #tpu.dot_dimension_numbers<[1], [0], [0], [1], [0, 0, 1, 1], [], []>} : vector<8x128xbf16>, vector<128x128xbf16>, vector<8x128xf32> -> vector<8x128xf32>
    %c0_4 = arith.constant 0 : index
    %c0_5 = arith.constant 0 : index
    %6 = vector.load %arg5[%c0_4, %c0_5] : memref<1x128xf32, #tpu.memory_space<vmem>>, vector<1x128xf32>
    %7 = vector.broadcast %6 : vector<1x128xf32> to vector<8x128xf32>
    %8 = arith.addf %5, %7 : vector<8x128xf32>
    %9 = arith.truncf %8 : vector<8x128xf32> to vector<8x128xbf16>
    %cst_6 = arith.constant 5.000000e-01 : bf16
    %10 = vector.broadcast %cst_6 : bf16 to vector<8x128xbf16>
    %11 = arith.mulf %10, %9 : vector<8x128xbf16>
    %cst_7 = arith.constant 4.467770e-02 : bf16
    %12 = vector.broadcast %cst_7 : bf16 to vector<8x128xbf16>
    %13 = arith.mulf %12, %9 : vector<8x128xbf16>
    %14 = arith.mulf %13, %9 : vector<8x128xbf16>
    %15 = arith.mulf %14, %9 : vector<8x128xbf16>
    %16 = arith.addf %9, %15 : vector<8x128xbf16>
    %cst_8 = arith.constant 7.968750e-01 : bf16
    %17 = vector.broadcast %cst_8 : bf16 to vector<8x128xbf16>
    %18 = arith.mulf %17, %16 : vector<8x128xbf16>
    %19 = math.tanh %18 : vector<8x128xbf16>
    %cst_9 = arith.constant 1.000000e+00 : bf16
    %20 = vector.broadcast %cst_9 : bf16 to vector<8x128xbf16>
    %21 = arith.addf %20, %19 : vector<8x128xbf16>
    %22 = arith.mulf %11, %21 : vector<8x128xbf16>
    %c0_10 = arith.constant 0 : index
    %c0_11 = arith.constant 0 : index
    %23 = vector.load %arg8[%c0_10, %c0_11] : memref<8x128xf32, #tpu.memory_space<vmem>>, vector<8x128xf32>
    %c0_12 = arith.constant 0 : index
    %c0_13 = arith.constant 0 : index
    %24 = vector.load %arg6[%c0_12, %c0_13] : memref<128x128xbf16, #tpu.memory_space<vmem>>, vector<128x128xbf16>
    %cst_14 = arith.constant dense<0.000000e+00> : vector<8x128xf32>
    %25 = tpu.matmul %22, %24, %cst_14 {dimension_numbers = #tpu.dot_dimension_numbers<[1], [0], [0], [1], [0, 0, 1, 1], [], []>} : vector<8x128xbf16>, vector<128x128xbf16>, vector<8x128xf32> -> vector<8x128xf32>
    %26 = arith.addf %23, %25 : vector<8x128xf32>
    %c0_15 = arith.constant 0 : index
    %c0_16 = arith.constant 0 : index
    %27 = vector.load %arg8[%c0_15, %c0_16] : memref<8x128xf32, #tpu.memory_space<vmem>>, vector<8x128xf32>
    tpu.vector_store %arg8[%c0_15, %c0_16], %26 {strides = array<i32>} : memref<8x128xf32, #tpu.memory_space<vmem>>, vector<8x128xf32>,
    %c0_i32_17 = arith.constant 0 : i32
    %28 = arith.cmpi eq, %arg1, %c0_i32_17 : i32
    %29 = arith.extui %28 : i1 to i32
    %c0_i32_18 = arith.constant 0 : i32
    %30 = arith.cmpi ne, %29, %c0_i32_18 : i32
    scf.if %30 {
      %c0_19 = arith.constant 0 : index
      %c0_20 = arith.constant 0 : index
      %31 = vector.load %arg8[%c0_19, %c0_20] : memref<8x128xf32, #tpu.memory_space<vmem>>, vector<8x128xf32>
      %c4 = arith.constant 4 : index
      %c0_21 = arith.constant 0 : index
      %32 = vector.load %arg3[%c4, %c0_21] : memref<8x128xf32, #tpu.memory_space<vmem>>, vector<1x128xf32>
      %33 = vector.broadcast %32 : vector<1x128xf32> to vector<8x128xf32>
      %34 = arith.addf %31, %33 : vector<8x128xf32>
      %c0_22 = arith.constant 0 : index
      %c0_23 = arith.constant 0 : index
      %35 = vector.load %arg7[%c0_22, %c0_23] : memref<8x128xf32, #tpu.memory_space<vmem>>, vector<8x128xf32>
      tpu.vector_store %arg7[%c0_22, %c0_23], %34 {strides = array<i32>} : memref<8x128xf32, #tpu.memory_space<vmem>>, vector<8x128xf32>,
    } else {
    }
    return
  }
  func.func @transform_0(%arg0: i32, %arg1: i32) -> (i32, i32) {
    %c0_i32 = arith.constant 0 : i32
    %c0_i32_0 = arith.constant 0 : i32
    return %arg0, %c0_i32 : i32, i32
  }
  func.func @transform_1(%arg0: i32, %arg1: i32) -> (i32, i32) {
    %c0_i32 = arith.constant 0 : i32
    %c0_i32_0 = arith.constant 0 : i32
    %c0_i32_1 = arith.constant 0 : i32
    return %c0_i32, %c0_i32_0 : i32, i32
  }
  func.func @transform_2(%arg0: i32, %arg1: i32) -> (i32, i32) {
    %c0_i32 = arith.constant 0 : i32
    %c0_i32_0 = arith.constant 0 : i32
    return %c0_i32, %arg1 : i32, i32
  }
  func.func @transform_3(%arg0: i32, %arg1: i32) -> (i32, i32) {
    %c0_i32 = arith.constant 0 : i32
    %c0_i32_0 = arith.constant 0 : i32
    return %c0_i32, %arg1 : i32, i32
  }
  func.func @transform_4(%arg0: i32, %arg1: i32) -> (i32, i32) {
    %c0_i32 = arith.constant 0 : i32
    %c0_i32_0 = arith.constant 0 : i32
    return %arg1, %c0_i32 : i32, i32
  }
  func.func @transform_5(%arg0: i32, %arg1: i32) -> (i32, i32) {
    %c0_i32 = arith.constant 0 : i32
    %c0_i32_0 = arith.constant 0 : i32
    return %arg0, %c0_i32 : i32, i32
  }
}

module attributes {stable_mosaic.version = 11 : i64} {
  func.func @kernel(%arg0: i32, %arg1: i32, %arg2: memref<8x128xf32, #tpu.memory_space<vmem>>, %arg3: memref<8x128xf32, #tpu.memory_space<vmem>>, %arg4: memref<128x128xbf16, #tpu.memory_space<vmem>>, %arg5: memref<1x128xf32, #tpu.memory_space<vmem>>, %arg6: memref<128x128xbf16, #tpu.memory_space<vmem>>, %arg7: memref<8x128xf32, #tpu.memory_space<vmem>>, %arg8: memref<8x128xf32, #tpu.memory_space<vmem>>, %arg9: memref<8x128xbf16, #tpu.memory_space<vmem>>) attributes {dimension_semantics = [#tpu.dimension_semantics<parallel>, #tpu.dimension_semantics<arbitrary>], iteration_bounds = array<i64: 2, 1>, scalar_prefetch = 0 : i64, scratch_operands = 2 : i64, tpu.core_type = #tpu.core_type<tc>, window_params = [{transform_indices = @transform_0, window_bounds = array<i64: 8, 128>}, {pipeline_mode = #tpu.pipeline_mode<synchronous>, transform_indices = @transform_1, window_bounds = array<i64: 8, 128>}, {transform_indices = @transform_2, window_bounds = array<i64: 128, 128>}, {transform_indices = @transform_3, window_bounds = array<i64: 1, 128>}, {transform_indices = @transform_4, window_bounds = array<i64: 128, 128>}, {transform_indices = @transform_5, window_bounds = array<i64: 8, 128>}]} {
    %c0_i32 = arith.constant 0 : i32
    %0 = arith.cmpi eq, %arg1, %c0_i32 : i32
    %1 = arith.extui %0 : i1 to i32
    %c0_i32_0 = arith.constant 0 : i32
    %2 = arith.cmpi ne, %1, %c0_i32_0 : i32
    scf.if %2 {
      %c0_19 = arith.constant 0 : index
      %c0_20 = arith.constant 0 : index
      %31 = vector.load %arg2[%c0_19, %c0_20] : memref<8x128xf32, #tpu.memory_space<vmem>>, vector<8x128xf32>
      %c0_21 = arith.constant 0 : index
      %c0_22 = arith.constant 0 : index
      %32 = vector.load %arg3[%c0_21, %c0_22] : memref<8x128xf32, #tpu.memory_space<vmem>>, vector<8x128xf32>
      %33 = tpu.iota {dimensions = array<i32: 1>} : vector<8x128xi32>
      %c32_i32 = arith.constant 32 : i32
      %34 = vector.broadcast %c32_i32 : i32 to vector<8x128xi32>
      %35 = arith.cmpi slt, %33, %34 : vector<8x128xi32>
      %36 = vector.extract_strided_slice %32 {offsets = [0, 0], sizes = [1, 128], strides = [1, 1]} : vector<8x128xf32> to vector<1x128xf32>
      %37 = vector.extract_strided_slice %32 {offsets = [1, 0], sizes = [1, 128], strides = [1, 1]} : vector<8x128xf32> to vector<1x128xf32>
      %cst_23 = arith.constant dense<0.000000e+00> : vector<8xf32>
      %38 = vector.multi_reduction <add>, %31, %cst_23 [1] : vector<8x128xf32> to vector<8xf32>
      %39 = vector.shape_cast %38 : vector<8xf32> to vector<8x1xf32>
      %cst_24 = arith.constant 3.125000e-02 : f32
      %40 = vector.broadcast %cst_24 : f32 to vector<8x1xf32>
      %41 = arith.mulf %39, %40 : vector<8x1xf32>
      %42 = vector.broadcast %41 : vector<8x1xf32> to vector<8x128xf32>
      %43 = arith.subf %31, %42 : vector<8x128xf32>
      %cst_25 = arith.constant 0.000000e+00 : f32
      %44 = vector.broadcast %cst_25 : f32 to vector<8x128xf32>
      %45 = arith.select %35, %43, %44 : vector<8x128xi1>, vector<8x128xf32>
      %46 = arith.mulf %45, %45 : vector<8x128xf32>
      %cst_26 = arith.constant dense<0.000000e+00> : vector<8xf32>
      %47 = vector.multi_reduction <add>, %46, %cst_26 [1] : vector<8x128xf32> to vector<8xf32>
      %48 = vector.shape_cast %47 : vector<8xf32> to vector<8x1xf32>
      %cst_27 = arith.constant 3.125000e-02 : f32
      %49 = vector.broadcast %cst_27 : f32 to vector<8x1xf32>
      %50 = arith.mulf %48, %49 : vector<8x1xf32>
      %cst_28 = arith.constant 9.99999974E-6 : f32
      %51 = vector.broadcast %cst_28 : f32 to vector<8x1xf32>
      %52 = arith.addf %50, %51 : vector<8x1xf32>
      %53 = math.rsqrt %52 : vector<8x1xf32>
      %54 = vector.broadcast %53 : vector<8x1xf32> to vector<8x128xf32>
      %55 = arith.mulf %45, %54 : vector<8x128xf32>
      %56 = vector.broadcast %36 : vector<1x128xf32> to vector<8x128xf32>
      %57 = arith.mulf %55, %56 : vector<8x128xf32>
      %58 = vector.broadcast %37 : vector<1x128xf32> to vector<8x128xf32>
      %59 = arith.addf %57, %58 : vector<8x128xf32>
      %60 = arith.addf %31, %59 : vector<8x128xf32>
      %c0_29 = arith.constant 0 : index
      %c0_30 = arith.constant 0 : index
      %61 = vector.load %arg8[%c0_29, %c0_30] : memref<8x128xf32, #tpu.memory_space<vmem>>, vector<8x128xf32>
      tpu.vector_store %arg8[%c0_29, %c0_30], %60 {strides = array<i32>} : memref<8x128xf32, #tpu.memory_space<vmem>>, vector<8x128xf32>,
      %62 = vector.extract_strided_slice %32 {offsets = [2, 0], sizes = [1, 128], strides = [1, 1]} : vector<8x128xf32> to vector<1x128xf32>
      %63 = vector.extract_strided_slice %32 {offsets = [3, 0], sizes = [1, 128], strides = [1, 1]} : vector<8x128xf32> to vector<1x128xf32>
      %cst_31 = arith.constant dense<0.000000e+00> : vector<8xf32>
      %64 = vector.multi_reduction <add>, %60, %cst_31 [1] : vector<8x128xf32> to vector<8xf32>
      %65 = vector.shape_cast %64 : vector<8xf32> to vector<8x1xf32>
      %cst_32 = arith.constant 3.125000e-02 : f32
      %66 = vector.broadcast %cst_32 : f32 to vector<8x1xf32>
      %67 = arith.mulf %65, %66 : vector<8x1xf32>
      %68 = vector.broadcast %67 : vector<8x1xf32> to vector<8x128xf32>
      %69 = arith.subf %60, %68 : vector<8x128xf32>
      %cst_33 = arith.constant 0.000000e+00 : f32
      %70 = vector.broadcast %cst_33 : f32 to vector<8x128xf32>
      %71 = arith.select %35, %69, %70 : vector<8x128xi1>, vector<8x128xf32>
      %72 = arith.mulf %71, %71 : vector<8x128xf32>
      %cst_34 = arith.constant dense<0.000000e+00> : vector<8xf32>
      %73 = vector.multi_reduction <add>, %72, %cst_34 [1] : vector<8x128xf32> to vector<8xf32>
      %74 = vector.shape_cast %73 : vector<8xf32> to vector<8x1xf32>
      %cst_35 = arith.constant 3.125000e-02 : f32
      %75 = vector.broadcast %cst_35 : f32 to vector<8x1xf32>
      %76 = arith.mulf %74, %75 : vector<8x1xf32>
      %cst_36 = arith.constant 9.99999974E-6 : f32
      %77 = vector.broadcast %cst_36 : f32 to vector<8x1xf32>
      %78 = arith.addf %76, %77 : vector<8x1xf32>
      %79 = math.rsqrt %78 : vector<8x1xf32>
      %80 = vector.broadcast %79 : vector<8x1xf32> to vector<8x128xf32>
      %81 = arith.mulf %71, %80 : vector<8x128xf32>
      %82 = vector.broadcast %62 : vector<1x128xf32> to vector<8x128xf32>
      %83 = arith.mulf %81, %82 : vector<8x128xf32>
      %84 = vector.broadcast %63 : vector<1x128xf32> to vector<8x128xf32>
      %85 = arith.addf %83, %84 : vector<8x128xf32>
      %86 = arith.truncf %85 : vector<8x128xf32> to vector<8x128xbf16>
      %c0_37 = arith.constant 0 : index
      %c0_38 = arith.constant 0 : index
      %87 = vector.load %arg9[%c0_37, %c0_38] : memref<8x128xbf16, #tpu.memory_space<vmem>>, vector<8x128xbf16>
      tpu.vector_store %arg9[%c0_37, %c0_38], %86 {strides = array<i32>} : memref<8x128xbf16, #tpu.memory_space<vmem>>, vector<8x128xbf16>,
    } else {
    }
    %c0 = arith.constant 0 : index
    %c0_1 = arith.constant 0 : index
    %3 = vector.load %arg9[%c0, %c0_1] : memref<8x128xbf16, #tpu.memory_space<vmem>>, vector<8x128xbf16>
    %c0_2 = arith.constant 0 : index
    %c0_3 = arith.constant 0 : index
    %4 = vector.load %arg4[%c0_2, %c0_3] : memref<128x128xbf16, #tpu.memory_space<vmem>>, vector<128x128xbf16>
    %cst = arith.constant dense<0.000000e+00> : vector<8x128xf32>
    %5 = tpu.matmul %3, %4, %cst {dimension_numbers = #tpu.dot_dimension_numbers<[1], [0], [0], [1], [0, 0, 1, 1], [], []>} : vector<8x128xbf16>, vector<128x128xbf16>, vector<8x128xf32> -> vector<8x128xf32>
    %c0_4 = arith.constant 0 : index
    %c0_5 = arith.constant 0 : index
    %6 = vector.load %arg5[%c0_4, %c0_5] : memref<1x128xf32, #tpu.memory_space<vmem>>, vector<1x128xf32>
    %7 = vector.broadcast %6 : vector<1x128xf32> to vector<8x128xf32>
    %8 = arith.addf %5, %7 : vector<8x128xf32>
    %9 = arith.truncf %8 : vector<8x128xf32> to vector<8x128xbf16>
    %cst_6 = arith.constant 5.000000e-01 : bf16
    %10 = vector.broadcast %cst_6 : bf16 to vector<8x128xbf16>
    %11 = arith.mulf %10, %9 : vector<8x128xbf16>
    %cst_7 = arith.constant 4.467770e-02 : bf16
    %12 = vector.broadcast %cst_7 : bf16 to vector<8x128xbf16>
    %13 = arith.mulf %12, %9 : vector<8x128xbf16>
    %14 = arith.mulf %13, %9 : vector<8x128xbf16>
    %15 = arith.mulf %14, %9 : vector<8x128xbf16>
    %16 = arith.addf %9, %15 : vector<8x128xbf16>
    %cst_8 = arith.constant 7.968750e-01 : bf16
    %17 = vector.broadcast %cst_8 : bf16 to vector<8x128xbf16>
    %18 = arith.mulf %17, %16 : vector<8x128xbf16>
    %19 = math.tanh %18 : vector<8x128xbf16>
    %cst_9 = arith.constant 1.000000e+00 : bf16
    %20 = vector.broadcast %cst_9 : bf16 to vector<8x128xbf16>
    %21 = arith.addf %20, %19 : vector<8x128xbf16>
    %22 = arith.mulf %11, %21 : vector<8x128xbf16>
    %c0_10 = arith.constant 0 : index
    %c0_11 = arith.constant 0 : index
    %23 = vector.load %arg8[%c0_10, %c0_11] : memref<8x128xf32, #tpu.memory_space<vmem>>, vector<8x128xf32>
    %c0_12 = arith.constant 0 : index
    %c0_13 = arith.constant 0 : index
    %24 = vector.load %arg6[%c0_12, %c0_13] : memref<128x128xbf16, #tpu.memory_space<vmem>>, vector<128x128xbf16>
    %cst_14 = arith.constant dense<0.000000e+00> : vector<8x128xf32>
    %25 = tpu.matmul %22, %24, %cst_14 {dimension_numbers = #tpu.dot_dimension_numbers<[1], [0], [0], [1], [0, 0, 1, 1], [], []>} : vector<8x128xbf16>, vector<128x128xbf16>, vector<8x128xf32> -> vector<8x128xf32>
    %26 = arith.addf %23, %25 : vector<8x128xf32>
    %c0_15 = arith.constant 0 : index
    %c0_16 = arith.constant 0 : index
    %27 = vector.load %arg8[%c0_15, %c0_16] : memref<8x128xf32, #tpu.memory_space<vmem>>, vector<8x128xf32>
    tpu.vector_store %arg8[%c0_15, %c0_16], %26 {strides = array<i32>} : memref<8x128xf32, #tpu.memory_space<vmem>>, vector<8x128xf32>,
    %c0_i32_17 = arith.constant 0 : i32
    %28 = arith.cmpi eq, %arg1, %c0_i32_17 : i32
    %29 = arith.extui %28 : i1 to i32
    %c0_i32_18 = arith.constant 0 : i32
    %30 = arith.cmpi ne, %29, %c0_i32_18 : i32
    scf.if %30 {
      %c0_19 = arith.constant 0 : index
      %c0_20 = arith.constant 0 : index
      %31 = vector.load %arg8[%c0_19, %c0_20] : memref<8x128xf32, #tpu.memory_space<vmem>>, vector<8x128xf32>
      %c4 = arith.constant 4 : index
      %c0_21 = arith.constant 0 : index
      %32 = vector.load %arg3[%c4, %c0_21] : memref<8x128xf32, #tpu.memory_space<vmem>>, vector<1x128xf32>
      %33 = vector.broadcast %32 : vector<1x128xf32> to vector<8x128xf32>
      %34 = arith.addf %31, %33 : vector<8x128xf32>
      %c0_22 = arith.constant 0 : index
      %c0_23 = arith.constant 0 : index
      %35 = vector.load %arg7[%c0_22, %c0_23] : memref<8x128xf32, #tpu.memory_space<vmem>>, vector<8x128xf32>
      tpu.vector_store %arg7[%c0_22, %c0_23], %34 {strides = array<i32>} : memref<8x128xf32, #tpu.memory_space<vmem>>, vector<8x128xf32>,
    } else {
    }
    return
  }
  func.func @transform_0(%arg0: i32, %arg1: i32) -> (i32, i32) {
    %c0_i32 = arith.constant 0 : i32
    %c0_i32_0 = arith.constant 0 : i32
    return %arg0, %c0_i32 : i32, i32
  }
  func.func @transform_1(%arg0: i32, %arg1: i32) -> (i32, i32) {
    %c0_i32 = arith.constant 0 : i32
    %c0_i32_0 = arith.constant 0 : i32
    %c0_i32_1 = arith.constant 0 : i32
    return %c0_i32, %c0_i32_0 : i32, i32
  }
  func.func @transform_2(%arg0: i32, %arg1: i32) -> (i32, i32) {
    %c0_i32 = arith.constant 0 : i32
    %c0_i32_0 = arith.constant 0 : i32
    return %c0_i32, %arg1 : i32, i32
  }
  func.func @transform_3(%arg0: i32, %arg1: i32) -> (i32, i32) {
    %c0_i32 = arith.constant 0 : i32
    %c0_i32_0 = arith.constant 0 : i32
    return %c0_i32, %arg1 : i32, i32
  }
  func.func @transform_4(%arg0: i32, %arg1: i32) -> (i32, i32) {
    %c0_i32 = arith.constant 0 : i32
    %c0_i32_0 = arith.constant 0 : i32
    return %arg1, %c0_i32 : i32, i32
  }
  func.func @transform_5(%arg0: i32, %arg1: i32) -> (i32, i32) {
    %c0_i32 = arith.constant 0 : i32
    %c0_i32_0 = arith.constant 0 : i32
    return %arg0, %c0_i32 : i32, i32
  }
}

</mosaic_0001>

<bundles_post_ra>
// kernel: _run.2
= control target key start
LH: loop header
LB: loop body
LE: loop exit
PB: predicated region body
PF: predicated region fallthrough
CT: control target
= control target key end

     0   :  { %10 = vsyncpa [#allocation5], 0  ;;  %s1152_s0 = inlined_call_operand.vmem [shape: f32[16,128], index: 0, kind: input, shape index: {}]   ;;  %s1153_s1 = inlined_call_operand.hbm [shape: f32[8,128], index: 1, kind: input, shape index: {}]   ;;  %s1154_s2 = inlined_call_operand.hbm [shape: bf16[128,128], index: 2, kind: input, shape index: {}]   ;;  %s1155_s3 = inlined_call_operand.hbm [shape: f32[1,128], index: 3, kind: input, shape index: {}]   ;;  %s1156_s4 = inlined_call_operand.hbm [shape: bf16[128,128], index: 4, kind: input, shape index: {}]   ;;  %s1157_s5 = inlined_call_operand.vmem [shape: f32[16,128], index: 5, kind: output, shape index: {}]  }
   0x1   :  { %11 = vsyncpa [#allocation7], 0 }
   0x2   :  { %12 = vsyncpa [#allocation10], 0  ;;  %s1050_s18 = smov 0   ;;  %s1052_s19 = smov 0  }
   0x3   :  { %s1054_s20 = smov 0  }
   0x4 LB: > { %s211_s23 = sshll.u32 %s1154_s2, 4  ;;  %s686_s24 = sadd.s32 4294967295, %s1012_s20   ;;  %s1012_s20 = sphi %s1054_s20, %s18_s20   ;;  %s1008_s19 = sphi %s1052_s19, %s1162_s19   ;;  %s1004_s18 = sphi %s1050_s18, %s1161_s18   ;;  %s212_s23 = int_to_ptr.hbm [resolvable:$true] %s211_s23 }
   0x5   : > { %p688_p0 = scmp.ge.s32.totalorder %s1012_s20, 1  ;;  %p186_p1 = scmp.lt.s32.totalorder %s1012_s20, 3 }
   0x6   : > { %p1071_p2 = scmp.eq.s32.totalorder %s686_s24, 0  ;;  %s1014_s27 = smov [#allocation6]  }
   0x7   : > { %p1075_p3 = pnand %p688_p0, %p186_p1  ;;  %s213_s28 = sshll.u32 %s1014_s27, 4  ;;  %s214_s28 = int_to_ptr.vmem [resolvable:$true] %s213_s28 }
   0x8   : > { %s30_s30 = sadd.s32 1, %s1008_s19  ;;  %s1015_s6 = smov 64  }
   0x9   : > { %p799_p4 = pneg %p1075_p3  ;;  %p32_p6 = scmp.ge.s32.totalorder %s30_s30, 2 }
   0xa   : > { %s1016_s7 = smov 4   ;;  %s198_s10 = sshll.u32 %s1153_s1, 4  ;;  %s199_s10 = int_to_ptr.hbm [resolvable:$true] %s198_s10 }
   0xb   : > { %p1083_p5 = pnand %p1071_p2, %p799_p4  ;;  %s1164_s30 = smov (%p32_p6, %s30_s30), 0 }
   0xc   : > { %s1017_s11 = smov [#allocation4]   ;;  %s227_s15 = sshll.u32 %s1155_s3, 4  ;;  %s228_s15 = int_to_ptr.hbm [resolvable:$true] %s227_s15 }
   0xd   : > { %805 = dma.hbm_to_vmem [thread:$0]  (!%p1083_p5), %s212_s23, 1024, %s214_s28, [#allocation7], %s1015_s6, %s1015_s6, %s1016_s7  }
   0xe   : > { %s200_s12 = sshll.u32 %s1017_s11, 4  ;;  %s1018_s16 = smov [#allocation8]   ;;  %s201_s12 = int_to_ptr.vmem [resolvable:$true] %s200_s12 }
   0xf   : > { %802 = dma.hbm_to_vmem [thread:$0]  (!%p1083_p5), %s199_s10, 128, %s201_s12, [#allocation5]  }
  0x10   : > { %s229_s17 = sshll.u32 %s1018_s16, 4  ;;  %s241_s23 = sshll.u32 %s1156_s4, 4  ;;  %s230_s17 = int_to_ptr.vmem [resolvable:$true] %s229_s17  ;;  %s242_s23 = int_to_ptr.hbm [resolvable:$true] %s241_s23 }
  0x11   : > { %808 = dma.hbm_to_vmem [thread:$0]  (!%p1083_p5), %s228_s15, 16, %s230_s17, [#allocation7]  }
  0x12   : > { %s1019_s24 = smov [#allocation9]   ;;  %266 = sbr.rel (%p1075_p3) target bundleno = 897 (0x381), region = 40 }
  0x13   : > { %s243_s27 = sshll.u32 %s1019_s24, 4  ;;  %s244_s27 = int_to_ptr.vmem [resolvable:$true] %s243_s27 }
  0x14   : > { %811 = dma.hbm_to_vmem [thread:$0]  (!%p1083_p5), %s242_s23, 1024, %s244_s27, [#allocation10], %s1015_s6, %s1015_s6, %s1016_s7  }
  0x17   : > { %991 = dma.done.wait (%p1071_p2), [#allocation5], 128  }
  0x18   : > { %993 = vsyncadd (%p1071_p2), [#allocation5], 4294967168 }
  0x19   : > { %995 = dma.done.wait (%p1071_p2), [#allocation7], 1040  }
  0x1a   : > { %997 = vsyncadd (%p1071_p2), [#allocation7], 4294966256 }
  0x1b   : > { %999 = dma.done.wait (%p1071_p2), [#allocation10], 1024  }
  0x1c   : > { %1001 = vsyncadd (%p1071_p2), [#allocation10], 4294966272  ;;  %p308_p7 = scmp.lt.s32.totalorder %s1004_s18, 1  ;;  %v323_v1 = vlaneseq  ;;  %v322_v16 = vld [vmem:[#allocation4] sm:$0xff]  ;;  %v773_v31 = vld [vmem:[#allocation6 + $0x30] sm:$0xff] }
  0x1d   : > { %v347_v18 = vperm.slane %v322_v16, 0  ;;  %v349_v21 = vperm.slane %v322_v16, 1  ;;  %v774_v30 = vld [vmem:[#allocation6 + $0x38] sm:$0xff]  ;;  %v772_v32 = vld [vmem:[#allocation6 + $0x28] sm:$0xff]  ;;  %v771_v33 = vld [vmem:[#allocation6 + $0x20] sm:$0xff]  ;;  %v374_v47 = vperm.slane %v322_v16, 2 }
  0x1e   : > { %s1166_s18 = smov (!%p308_p7, %s1004_s18), 1  ;;  %v324_v2 = vand.u32 127, %v323_v1  ;;  %449 = vmatpush.bf16.msra.mxu0 %v774_v30  ;;  %v770_v34 = vld [vmem:[#allocation6 + $0x18] sm:$0xff]  ;;  %v769_v35 = vld [vmem:[#allocation6 + $0x10] sm:$0xff]  ;;  %v768_v36 = vld [vmem:[#allocation6 + $0x8] sm:$0xff]  ;;  %v376_v49 = vperm.slane %v322_v16, 3 }
  0x1f   : > { %s699_s26 = sshll.u32 %s1166_s18, 3  ;;  %v767_v38 = vld [vmem:[#allocation6] sm:$0xff]  ;;  %v781_v56 = vld [vmem:[#allocation9 + $0x30] sm:$0xff]  ;;  %v780_v57 = vld [vmem:[#allocation9 + $0x28] sm:$0xff] }
  0x20   : > { %s311_s6 = scalar_lea.vmem %s1152_s0, %s699_s26  ;;  %vm325_vm0 = vcmp.lt.s32.totalorder %v324_v2, 32  ;;  %v782_v55 = vld [vmem:[#allocation9 + $0x38] sm:$0xff]  ;;  %v779_v58 = vld [vmem:[#allocation9 + $0x20] sm:$0xff]  ;;  %s316_s8 = scalar_lea.vmem %s1157_s5, %s699_s26 }
  0x21   : > { %v321_v0 = vld [vmem:[%s311_s6] sm:$0xff]  ;;  %555 = vmatpush.bf16.msra.mxu1 %v782_v55  ;;  %v850_v59 = vld [vmem:[#allocation8] ss:$0 sm:$0xff] }
  0x22   : > { %326 = vadd.xlane.f32.xlu0 %v321_v0  ;;  %450 = vmatpush.bf16.msra.mxu0 %v773_v31  ;;  %v778_v60 = vld [vmem:[#allocation9 + $0x18] sm:$0xff] }
  0x25   : > { %556 = vmatpush.bf16.msra.mxu1 %v781_v56 }
  0x26   : > { %451 = vmatpush.bf16.msra.mxu0 %v772_v32  ;;  %v851_v32 = vld [vmem:[#allocation4 + $0x4] ss:$0 sm:$0xff] }
  0x29   : > { %557 = vmatpush.bf16.msra.mxu1 %v780_v57 }
  0x2a   : > { %452 = vmatpush.bf16.msra.mxu0 %v771_v33 }
  0x2d   : > { %558 = vmatpush.bf16.msra.mxu1 %v779_v58 }
  0x2e   : > { %453 = vmatpush.bf16.msra.mxu0 %v770_v34 }
  0x31   : > { %559 = vmatpush.bf16.msra.mxu1 %v778_v60 }
  0x32   : > { %454 = vmatpush.bf16.msra.mxu0 %v769_v35 }
  0x36   : > { %455 = vmatpush.bf16.msra.mxu0 %v768_v36 }
  0x3a   : > { %456 = vmatpush.bf16.msra.mxu0 %v767_v38 }
  0x95   : > { %v327_v3 = vpop.xlane.xlu0 %326 }
  0x96   : > { %v328_v4 = vmul.f32 0.03125, %v327_v3  ;;  %v776_v3 = vld [vmem:[#allocation9 + $0x8] sm:$0xff] }
  0x98   : > { %v329_v5 = vsub.f32 %v321_v0, %v328_v4 }
  0x9a   : > { %v330_v6 = vsel %vm325_vm0, %v329_v5, 0.0 }
  0x9b   : > { %v331_v7 = vmul.f32 %v330_v6, %v330_v6 }
  0x9d   : > { %332 = vadd.xlane.f32.xlu0 %v331_v7  ;;  %v775_v7 = vld [vmem:[#allocation9] sm:$0xff] }
 0x110   : > { %v333_v8 = vpop.xlane.xlu0 %332 }
 0x111   : > { %v334_v9 = vmul.f32 0.03125, %v333_v8 }
 0x113   : > { %v335_v10 = vadd.f32 1e-05, %v334_v9 }
 0x115   : > { %852 = vrsqrt.f32 %v335_v10  ;;  %vm342_vm2 = vweird.f32 %v335_v10 }
 0x11b   : > { %v853_v11 = vpop.eup %852 }
 0x11c   : > { %v337_v12 = vmul.f32 %v853_v11, %v335_v10  ;;  %vm343_vm1 = vweird.f32 %v853_v11 }
 0x11d   : > { %vm344_vm3 = vmor %vm342_vm2, %vm343_vm1 }
 0x11e   : > { %v338_v13 = vmul.f32 %v853_v11, %v337_v12 }
 0x120   : > { %v339_v14 = vmul.f32 0.5, %v338_v13 }
 0x122   : > { %v340_v15 = vsub.f32 1.5, %v339_v14 }
 0x124   : > { %v341_v17 = vmul.f32 %v853_v11, %v340_v15 }
 0x126   : > { %v345_v19 = vsel %vm344_vm3, %v853_v11, %v341_v17 }
 0x127   : > { %v346_v20 = vmul.f32 %v345_v19, %v330_v6 }
 0x129   : > { %v348_v22 = vmul.f32 %v347_v18, %v346_v20 }
 0x12b   : > { %v350_v23 = vadd.f32 %v349_v21, %v348_v22 }
 0x12d   : > { %v1132_v24 = vadd.f32 %v350_v23, %v321_v0  ;;  %v777_v0 = vld [vmem:[#allocation9 + $0x10] sm:$0xff] }
 0x12e   : > { %560 = vmatpush.bf16.msra.mxu1 %v777_v0 }
 0x12f   : > { %353 = vadd.xlane.f32.xlu1 %v1132_v24 }
 0x132   : > { %561 = vmatpush.bf16.msra.mxu1 %v776_v3 }
 0x136   : > { %562 = vmatpush.bf16.msra.mxu1 %v775_v7 }
 0x1a2   : > { %v354_v25 = vpop.xlane.xlu1 %353 }
 0x1a3   : > { %v355_v26 = vmul.f32 0.03125, %v354_v25 }
 0x1a5   : > { %v356_v27 = vsub.f32 %v1132_v24, %v355_v26 }
 0x1a7   : > { %v357_v28 = vsel %vm325_vm0, %v356_v27, 0.0 }
 0x1a8   : > { %v358_v29 = vmul.f32 %v357_v28, %v357_v28 }
 0x1aa   : > { %359 = vadd.xlane.f32.xlu1 %v358_v29 }
 0x21d   : > { %v360_v37 = vpop.xlane.xlu1 %359 }
 0x21e   : > { %v361_v39 = vmul.f32 0.03125, %v360_v37 }
 0x220   : > { %v362_v40 = vadd.f32 1e-05, %v361_v39 }
 0x222   : > { %854 = vrsqrt.f32 %v362_v40  ;;  %vm369_vm5 = vweird.f32 %v362_v40 }
 0x228   : > { %v855_v41 = vpop.eup %854 }
 0x229   : > { %v364_v42 = vmul.f32 %v855_v41, %v362_v40  ;;  %vm370_vm4 = vweird.f32 %v855_v41 }
 0x22a   : > { %vm371_vm6 = vmor %vm369_vm5, %vm370_vm4 }
 0x22b   : > { %v365_v43 = vmul.f32 %v855_v41, %v364_v42 }
 0x22d   : > { %v366_v44 = vmul.f32 0.5, %v365_v43 }
 0x22f   : > { %v367_v45 = vsub.f32 1.5, %v366_v44 }
 0x231   : > { %v368_v46 = vmul.f32 %v855_v41, %v367_v45 }
 0x233   : > { %v372_v48 = vsel %vm371_vm6, %v855_v41, %v368_v46 }
 0x234   : > { %v373_v50 = vmul.f32 %v372_v48, %v357_v28 }
 0x236   : > { %v375_v51 = vmul.f32 %v374_v47, %v373_v50 }
 0x238   : > { %v377_v52 = vadd.f32 %v376_v49, %v375_v51 }
 0x23a   : > { %v378_v53 = vpack.c.bf16 %v377_v52, %v377_v52 }
 0x23c   : > { %379 = vst [vmem:[#allocation3] sm:$0xf] %v378_v53 }
 0x243   : > { %v380_v54 = vld [vmem:[#allocation3] sm:$0xf] }
 0x244   : > { %457 = vmatmul.bf16.vlgmr.msra.gmra.mxu0 %v380_v54 }
 0x2c1   : > { %v458_v61 = vpop.f32.mrf.mxu0 }
 0x2c2   : > { %v459_v62 = vadd.f32 %v850_v59, %v458_v61 }
 0x2c4   : > { %v462_v63 = vpack.c.bf16 %v459_v62, %v459_v62 }
 0x2c6   : > { %v463_v1 = vunpack.c.l.bf16 %v462_v63 }
 0x2c8   : > { %v466_v2 = vmul.f32 0.044677734, %v463_v1  ;;  %v464_v21 = vmul.f32 0.5, %v463_v1 }
 0x2c9   : > { %v460_v4 = vpop.f32.mrf.mxu0 }
 0x2ca   : > { %v467_v5 = vpack.c.bf16 %v466_v2, %v466_v2  ;;  %v465_v25 = vpack.c.bf16 %v464_v21, %v464_v21 }
 0x2cc   : > { %v468_v6 = vunpack.c.l.bf16 %v467_v5  ;;  %v486_v28 = vunpack.c.l.bf16 %v465_v25 }
 0x2ce   : > { %v469_v8 = vmul.f32 %v468_v6, %v463_v1 }
 0x2d0   : > { %v470_v9 = vpack.c.bf16 %v469_v8, %v469_v8 }
 0x2d2   : > { %v471_v10 = vunpack.c.l.bf16 %v470_v9 }
 0x2d4   : > { %v472_v11 = vmul.f32 %v471_v10, %v463_v1 }
 0x2d6   : > { %v473_v12 = vpack.c.bf16 %v472_v11, %v472_v11 }
 0x2d8   : > { %v474_v13 = vunpack.c.l.bf16 %v473_v12 }
 0x2da   : > { %v475_v14 = vadd.f32 %v474_v13, %v463_v1 }
 0x2dc   : > { %v476_v15 = vpack.c.bf16 %v475_v14, %v475_v14 }
 0x2de   : > { %v477_v16 = vunpack.c.l.bf16 %v476_v15 }
 0x2e0   : > { %v478_v17 = vmul.f32 0.796875, %v477_v16 }
 0x2e2   : > { %v479_v18 = vpack.c.bf16 %v478_v17, %v478_v17 }
 0x2e4   : > { %v480_v19 = vunpack.c.l.bf16 %v479_v18 }
 0x2e6   : > { %856 = vtanh.f32 %v480_v19 }
 0x2ec   : > { %v857_v20 = vpop.eup %856 }
 0x2ed   : > { %v482_v22 = vpack.c.bf16 %v857_v20, %v857_v20 }
 0x2ef   : > { %v483_v23 = vunpack.c.l.bf16 %v482_v22 }
 0x2f1   : > { %v484_v26 = vadd.f32 1.0, %v483_v23 }
 0x2f3   : > { %v485_v27 = vpack.c.bf16 %v484_v26, %v484_v26 }
 0x2f5   : > { %v487_v29 = vunpack.c.l.bf16 %v485_v27 }
 0x2f7   : > { %v488_v30 = vmul.f32 %v487_v29, %v486_v28 }
 0x2f9   : > { %v489_v31 = vpack.c.bf16 %v488_v30, %v488_v30 }
 0x2fb   : > { %563 = vmatmul.bf16.vlgmr.msra.gmra.mxu1 %v489_v31 }
 0x378   : > { %v564_v33 = vpop.f32.mrf.mxu1 }
 0x379   : > { %v568_v34 = vadd.f32 %v564_v33, %v1132_v24 }
 0x37b   : > { %v576_v35 = vadd.f32 %v851_v32, %v568_v34 }
 0x37d   : > { %577 = vst [vmem:[%s316_s8] sm:$0xff] %v576_v35 }
 0x380   : > { %v566_v36 = vpop.f32.mrf.mxu1 }
 0x381 PF: > { %s18_s20 = sadd.s32 1, %s1012_s20   ;;  %s1161_s18 = smov %s1008_s19 }
 0x382   : > { %p15_p8 = scmp.ge.s32.totalorder %s18_s20, 4   ;;  %s1162_s19 = smov %s1164_s30 }
 0x384   :  { %17 = sbr.rel (!%p15_p8) target bundleno = 4 (0x4), region = 98 }
 0x389   :  { %597 = vsyncpa [#allocation5], 1 }
 0x38a   :  { %599 = vsyncpa [#allocation5 + $0x1], 1 }
 0x38b   :  { %600 = vsyncpa [#allocation7], 1 }
 0x38c   :  { %601 = vsyncpa [#allocation10], 1 }

// kernel: _run.3
= control target key start
LH: loop header
LB: loop body
LE: loop exit
PB: predicated region body
PF: predicated region fallthrough
CT: control target
= control target key end

     0   :  { %10 = vsyncpa [#allocation5], 0  ;;  %s1044_s0 = inlined_call_operand.vmem [shape: f32[16,128], index: 0, kind: input, shape index: {}]   ;;  %s1045_s1 = inlined_call_operand.vmem [shape: f32[8,128], index: 1, kind: input, shape index: {}]   ;;  %s1046_s2 = inlined_call_operand.vmem [shape: bf16[128,128], index: 2, kind: input, shape index: {}]   ;;  %s1047_s3 = inlined_call_operand.hbm [shape: f32[1,128], index: 3, kind: input, shape index: {}]   ;;  %s1048_s4 = inlined_call_operand.hbm [shape: bf16[128,128], index: 4, kind: input, shape index: {}]   ;;  %s1049_s5 = inlined_call_operand.vmem [shape: f32[16,128], index: 5, kind: output, shape index: {}]  }
   0x1   :  { %11 = vsyncpa [#allocation7], 0  ;;  %s934_s18 = smov 0   ;;  %s936_s19 = smov 0  }
   0x2   :  { %s938_s20 = smov 0  }
   0x3 LB: > { %s659_s21 = sadd.s32 4294967295, %s898_s20   ;;  %s29_s22 = sadd.s32 1, %s894_s19  ;;  %s898_s20 = sphi %s938_s20, %s17_s20   ;;  %s894_s19 = sphi %s936_s19, %s1053_s19   ;;  %s890_s18 = sphi %s934_s18, %s1052_s18  }
   0x4   : > { %p31_p0 = scmp.ge.s32.totalorder %s29_s22, 2  ;;  %p661_p1 = scmp.ge.s32.totalorder %s898_s20, 1 }
   0x5   : > { %p185_p2 = scmp.lt.s32.totalorder %s898_s20, 3  ;;  %p959_p4 = scmp.eq.s32.totalorder %s659_s21, 0 }
   0x6   : > { %s1055_s22 = smov (%p31_p0, %s29_s22), 0  ;;  %s208_s27 = sshll.u32 %s1047_s3, 4  ;;  %s209_s27 = int_to_ptr.hbm [resolvable:$true] %s208_s27 }
   0x7   : > { %p955_p3 = pnand %p661_p1, %p185_p2  ;;  %s900_s28 = smov [#allocation4]  }
   0x8   : > { %s210_s29 = sshll.u32 %s900_s28, 4  ;;  %s222_s7 = sshll.u32 %s1048_s4, 4  ;;  %s211_s29 = int_to_ptr.vmem [resolvable:$true] %s210_s29  ;;  %s223_s7 = int_to_ptr.hbm [resolvable:$true] %s222_s7 }
   0x9   : > { %p761_p5 = pneg %p955_p3  ;;  %s901_s8 = smov [#allocation6]  }
   0xa   : > { %s224_s9 = sshll.u32 %s901_s8, 4  ;;  %s902_s10 = smov 64   ;;  %s225_s9 = int_to_ptr.vmem [resolvable:$true] %s224_s9 }
   0xb   : > { %p762_p6 = pnand %p959_p4, %p761_p5  ;;  %s903_s11 = smov 4  }
   0xc   : > { %247 = sbr.rel (%p955_p3) target bundleno = 889 (0x379), region = 40 }
   0xd   : > { %764 = dma.hbm_to_vmem [thread:$0]  (!%p762_p6), %s209_s27, 16, %s211_s29, [#allocation5]  }
   0xe   : > { %767 = dma.hbm_to_vmem [thread:$0]  (!%p762_p6), %s223_s7, 1024, %s225_s9, [#allocation7], %s902_s10, %s902_s10, %s903_s11  }
  0x11   : > { %881 = dma.done.wait (%p959_p4), [#allocation5], 16  }
  0x12   : > { %883 = vsyncadd (%p959_p4), [#allocation5], 4294967280 }
  0x13   : > { %885 = dma.done.wait (%p959_p4), [#allocation7], 1024  }
  0x14   : > { %887 = vsyncadd (%p959_p4), [#allocation7], 4294966272  ;;  %p283_p7 = scmp.lt.s32.totalorder %s890_s18, 1  ;;  %v302_v1 = vlaneseq  ;;  %v301_v16 = vld [vmem:[%s1045_s1] sm:$0xff]  ;;  %v744_v30 = vld [vmem:[%s1046_s2 + $0x38] sm:$0xff] }
  0x15   : > { %v326_v18 = vperm.slane %v301_v16, 0  ;;  %v328_v21 = vperm.slane %v301_v16, 1  ;;  %428 = vmatpush.bf16.msra.mxu0 %v744_v30  ;;  %v743_v31 = vld [vmem:[%s1046_s2 + $0x30] sm:$0xff]  ;;  %v742_v32 = vld [vmem:[%s1046_s2 + $0x28] sm:$0xff]  ;;  %v741_v33 = vld [vmem:[%s1046_s2 + $0x20] sm:$0xff]  ;;  %v353_v47 = vperm.slane %v301_v16, 2 }
  0x16   : > { %s1057_s18 = smov (!%p283_p7, %s890_s18), 1  ;;  %v303_v2 = vand.u32 127, %v302_v1  ;;  %v740_v34 = vld [vmem:[%s1046_s2 + $0x18] sm:$0xff]  ;;  %v739_v35 = vld [vmem:[%s1046_s2 + $0x10] sm:$0xff]  ;;  %v738_v36 = vld [vmem:[%s1046_s2 + $0x8] sm:$0xff]  ;;  %v355_v49 = vperm.slane %v301_v16, 3 }
  0x17   : > { %s669_s12 = sshll.u32 %s1057_s18, 3  ;;  %v737_v38 = vld [vmem:[%s1046_s2] sm:$0xff]  ;;  %v751_v56 = vld [vmem:[#allocation6 + $0x30] sm:$0xff]  ;;  %v750_v57 = vld [vmem:[#allocation6 + $0x28] sm:$0xff] }
  0x18   : > { %s286_s15 = scalar_lea.vmem %s1044_s0, %s669_s12  ;;  %vm304_vm0 = vcmp.lt.s32.totalorder %v303_v2, 32  ;;  %v752_v55 = vld [vmem:[#allocation6 + $0x38] sm:$0xff]  ;;  %v749_v58 = vld [vmem:[#allocation6 + $0x20] sm:$0xff]  ;;  %s295_s21 = scalar_lea.vmem %s1049_s5, %s669_s12 }
  0x19   : > { %v300_v0 = vld [vmem:[%s286_s15] sm:$0xff]  ;;  %429 = vmatpush.bf16.msra.mxu0 %v743_v31  ;;  %534 = vmatpush.bf16.msra.mxu1 %v752_v55 }
  0x1a   : > { %305 = vadd.xlane.f32.xlu0 %v300_v0  ;;  %v800_v59 = vld [vmem:[#allocation4] ss:$0 sm:$0xff] }
  0x1b   : > { %v748_v60 = vld [vmem:[#allocation6 + $0x18] sm:$0xff] }
  0x1d   : > { %430 = vmatpush.bf16.msra.mxu0 %v742_v32  ;;  %535 = vmatpush.bf16.msra.mxu1 %v751_v56  ;;  %v801_v32 = vld [vmem:[%s1045_s1 + $0x4] ss:$0 sm:$0xff] }
  0x21   : > { %431 = vmatpush.bf16.msra.mxu0 %v741_v33  ;;  %536 = vmatpush.bf16.msra.mxu1 %v750_v57 }
  0x25   : > { %432 = vmatpush.bf16.msra.mxu0 %v740_v34  ;;  %537 = vmatpush.bf16.msra.mxu1 %v749_v58 }
  0x29   : > { %433 = vmatpush.bf16.msra.mxu0 %v739_v35  ;;  %538 = vmatpush.bf16.msra.mxu1 %v748_v60 }
  0x2d   : > { %434 = vmatpush.bf16.msra.mxu0 %v738_v36 }
  0x31   : > { %435 = vmatpush.bf16.msra.mxu0 %v737_v38 }
  0x8d   : > { %v306_v3 = vpop.xlane.xlu0 %305 }
  0x8e   : > { %v307_v4 = vmul.f32 0.03125, %v306_v3  ;;  %v746_v3 = vld [vmem:[#allocation6 + $0x8] sm:$0xff] }
  0x90   : > { %v308_v5 = vsub.f32 %v300_v0, %v307_v4 }
  0x92   : > { %v309_v6 = vsel %vm304_vm0, %v308_v5, 0.0 }
  0x93   : > { %v310_v7 = vmul.f32 %v309_v6, %v309_v6 }
  0x95   : > { %311 = vadd.xlane.f32.xlu0 %v310_v7  ;;  %v745_v7 = vld [vmem:[#allocation6] sm:$0xff] }
 0x108   : > { %v312_v8 = vpop.xlane.xlu0 %311 }
 0x109   : > { %v313_v9 = vmul.f32 0.03125, %v312_v8 }
 0x10b   : > { %v314_v10 = vadd.f32 1e-05, %v313_v9 }
 0x10d   : > { %802 = vrsqrt.f32 %v314_v10  ;;  %vm321_vm2 = vweird.f32 %v314_v10 }
 0x113   : > { %v803_v11 = vpop.eup %802 }
 0x114   : > { %v316_v12 = vmul.f32 %v803_v11, %v314_v10  ;;  %vm322_vm1 = vweird.f32 %v803_v11 }
 0x115   : > { %vm323_vm3 = vmor %vm321_vm2, %vm322_vm1 }
 0x116   : > { %v317_v13 = vmul.f32 %v803_v11, %v316_v12 }
 0x118   : > { %v318_v14 = vmul.f32 0.5, %v317_v13 }
 0x11a   : > { %v319_v15 = vsub.f32 1.5, %v318_v14 }
 0x11c   : > { %v320_v17 = vmul.f32 %v803_v11, %v319_v15 }
 0x11e   : > { %v324_v19 = vsel %vm323_vm3, %v803_v11, %v320_v17 }
 0x11f   : > { %v325_v20 = vmul.f32 %v324_v19, %v309_v6 }
 0x121   : > { %v327_v22 = vmul.f32 %v326_v18, %v325_v20 }
 0x123   : > { %v329_v23 = vadd.f32 %v328_v21, %v327_v22 }
 0x125   : > { %v997_v24 = vadd.f32 %v329_v23, %v300_v0  ;;  %v747_v0 = vld [vmem:[#allocation6 + $0x10] sm:$0xff] }
 0x126   : > { %539 = vmatpush.bf16.msra.mxu1 %v747_v0 }
 0x127   : > { %332 = vadd.xlane.f32.xlu1 %v997_v24 }
 0x12a   : > { %540 = vmatpush.bf16.msra.mxu1 %v746_v3 }
 0x12e   : > { %541 = vmatpush.bf16.msra.mxu1 %v745_v7 }
 0x19a   : > { %v333_v25 = vpop.xlane.xlu1 %332 }
 0x19b   : > { %v334_v26 = vmul.f32 0.03125, %v333_v25 }
 0x19d   : > { %v335_v27 = vsub.f32 %v997_v24, %v334_v26 }
 0x19f   : > { %v336_v28 = vsel %vm304_vm0, %v335_v27, 0.0 }
 0x1a0   : > { %v337_v29 = vmul.f32 %v336_v28, %v336_v28 }
 0x1a2   : > { %338 = vadd.xlane.f32.xlu1 %v337_v29 }
 0x215   : > { %v339_v37 = vpop.xlane.xlu1 %338 }
 0x216   : > { %v340_v39 = vmul.f32 0.03125, %v339_v37 }
 0x218   : > { %v341_v40 = vadd.f32 1e-05, %v340_v39 }
 0x21a   : > { %804 = vrsqrt.f32 %v341_v40  ;;  %vm348_vm5 = vweird.f32 %v341_v40 }
 0x220   : > { %v805_v41 = vpop.eup %804 }
 0x221   : > { %v343_v42 = vmul.f32 %v805_v41, %v341_v40  ;;  %vm349_vm4 = vweird.f32 %v805_v41 }
 0x222   : > { %vm350_vm6 = vmor %vm348_vm5, %vm349_vm4 }
 0x223   : > { %v344_v43 = vmul.f32 %v805_v41, %v343_v42 }
 0x225   : > { %v345_v44 = vmul.f32 0.5, %v344_v43 }
 0x227   : > { %v346_v45 = vsub.f32 1.5, %v345_v44 }
 0x229   : > { %v347_v46 = vmul.f32 %v805_v41, %v346_v45 }
 0x22b   : > { %v351_v48 = vsel %vm350_vm6, %v805_v41, %v347_v46 }
 0x22c   : > { %v352_v50 = vmul.f32 %v351_v48, %v336_v28 }
 0x22e   : > { %v354_v51 = vmul.f32 %v353_v47, %v352_v50 }
 0x230   : > { %v356_v52 = vadd.f32 %v355_v49, %v354_v51 }
 0x232   : > { %v357_v53 = vpack.c.bf16 %v356_v52, %v356_v52 }
 0x234   : > { %358 = vst [vmem:[#allocation3] sm:$0xf] %v357_v53 }
 0x23b   : > { %v359_v54 = vld [vmem:[#allocation3] sm:$0xf] }
 0x23c   : > { %436 = vmatmul.bf16.vlgmr.msra.gmra.mxu0 %v359_v54 }
 0x2b9   : > { %v437_v61 = vpop.f32.mrf.mxu0 }
 0x2ba   : > { %v438_v62 = vadd.f32 %v800_v59, %v437_v61 }
 0x2bc   : > { %v441_v63 = vpack.c.bf16 %v438_v62, %v438_v62 }
 0x2be   : > { %v442_v1 = vunpack.c.l.bf16 %v441_v63 }
 0x2c0   : > { %v445_v2 = vmul.f32 0.044677734, %v442_v1  ;;  %v443_v21 = vmul.f32 0.5, %v442_v1 }
 0x2c1   : > { %v439_v4 = vpop.f32.mrf.mxu0 }
 0x2c2   : > { %v446_v5 = vpack.c.bf16 %v445_v2, %v445_v2  ;;  %v444_v25 = vpack.c.bf16 %v443_v21, %v443_v21 }
 0x2c4   : > { %v447_v6 = vunpack.c.l.bf16 %v446_v5  ;;  %v465_v28 = vunpack.c.l.bf16 %v444_v25 }
 0x2c6   : > { %v448_v8 = vmul.f32 %v447_v6, %v442_v1 }
 0x2c8   : > { %v449_v9 = vpack.c.bf16 %v448_v8, %v448_v8 }
 0x2ca   : > { %v450_v10 = vunpack.c.l.bf16 %v449_v9 }
 0x2cc   : > { %v451_v11 = vmul.f32 %v450_v10, %v442_v1 }
 0x2ce   : > { %v452_v12 = vpack.c.bf16 %v451_v11, %v451_v11 }
 0x2d0   : > { %v453_v13 = vunpack.c.l.bf16 %v452_v12 }
 0x2d2   : > { %v454_v14 = vadd.f32 %v453_v13, %v442_v1 }
 0x2d4   : > { %v455_v15 = vpack.c.bf16 %v454_v14, %v454_v14 }
 0x2d6   : > { %v456_v16 = vunpack.c.l.bf16 %v455_v15 }
 0x2d8   : > { %v457_v17 = vmul.f32 0.796875, %v456_v16 }
 0x2da   : > { %v458_v18 = vpack.c.bf16 %v457_v17, %v457_v17 }
 0x2dc   : > { %v459_v19 = vunpack.c.l.bf16 %v458_v18 }
 0x2de   : > { %806 = vtanh.f32 %v459_v19 }
 0x2e4   : > { %v807_v20 = vpop.eup %806 }
 0x2e5   : > { %v461_v22 = vpack.c.bf16 %v807_v20, %v807_v20 }
 0x2e7   : > { %v462_v23 = vunpack.c.l.bf16 %v461_v22 }
 0x2e9   : > { %v463_v26 = vadd.f32 1.0, %v462_v23 }
 0x2eb   : > { %v464_v27 = vpack.c.bf16 %v463_v26, %v463_v26 }
 0x2ed   : > { %v466_v29 = vunpack.c.l.bf16 %v464_v27 }
 0x2ef   : > { %v467_v30 = vmul.f32 %v466_v29, %v465_v28 }
 0x2f1   : > { %v468_v31 = vpack.c.bf16 %v467_v30, %v467_v30 }
 0x2f3   : > { %542 = vmatmul.bf16.vlgmr.msra.gmra.mxu1 %v468_v31 }
 0x370   : > { %v543_v33 = vpop.f32.mrf.mxu1 }
 0x371   : > { %v547_v34 = vadd.f32 %v543_v33, %v997_v24 }
 0x373   : > { %v555_v35 = vadd.f32 %v801_v32, %v547_v34 }
 0x375   : > { %556 = vst [vmem:[%s295_s21] sm:$0xff] %v555_v35 }
 0x378   : > { %v545_v36 = vpop.f32.mrf.mxu1 }
 0x379 PF: > { %s17_s20 = sadd.s32 1, %s898_s20   ;;  %s1052_s18 = smov %s894_s19 }
 0x37a   : > { %p14_p8 = scmp.ge.s32.totalorder %s17_s20, 4   ;;  %s1053_s19 = smov %s1055_s22 }
 0x37c   :  { %16 = sbr.rel (!%p14_p8) target bundleno = 3 (0x3), region = 92 }
 0x381   :  { %576 = vsyncpa [#allocation5], 1 }
 0x382   :  { %578 = vsyncpa [#allocation5 + $0x1], 1 }
 0x383   :  { %579 = vsyncpa [#allocation7], 1 }

// kernel: _run.3
= control target key start
LH: loop header
LB: loop body
LE: loop exit
PB: predicated region body
PF: predicated region fallthrough
CT: control target
= control target key end

     0   :  { %10 = vsyncpa [#allocation5], 0  ;;  %s1044_s0 = inlined_call_operand.vmem [shape: f32[16,128], index: 0, kind: input, shape index: {}]   ;;  %s1045_s1 = inlined_call_operand.vmem [shape: f32[8,128], index: 1, kind: input, shape index: {}]   ;;  %s1046_s2 = inlined_call_operand.vmem [shape: bf16[128,128], index: 2, kind: input, shape index: {}]   ;;  %s1047_s3 = inlined_call_operand.hbm [shape: f32[1,128], index: 3, kind: input, shape index: {}]   ;;  %s1048_s4 = inlined_call_operand.hbm [shape: bf16[128,128], index: 4, kind: input, shape index: {}]   ;;  %s1049_s5 = inlined_call_operand.vmem [shape: f32[16,128], index: 5, kind: output, shape index: {}]  }
   0x1   :  { %11 = vsyncpa [#allocation7], 0  ;;  %s934_s18 = smov 0   ;;  %s936_s19 = smov 0  }
   0x2   :  { %s938_s20 = smov 0  }
   0x3 LB: > { %s659_s21 = sadd.s32 4294967295, %s898_s20   ;;  %s29_s22 = sadd.s32 1, %s894_s19  ;;  %s898_s20 = sphi %s938_s20, %s17_s20   ;;  %s894_s19 = sphi %s936_s19, %s1053_s19   ;;  %s890_s18 = sphi %s934_s18, %s1052_s18  }
   0x4   : > { %p31_p0 = scmp.ge.s32.totalorder %s29_s22, 2  ;;  %p661_p1 = scmp.ge.s32.totalorder %s898_s20, 1 }
   0x5   : > { %p185_p2 = scmp.lt.s32.totalorder %s898_s20, 3  ;;  %p959_p4 = scmp.eq.s32.totalorder %s659_s21, 0 }
   0x6   : > { %s1055_s22 = smov (%p31_p0, %s29_s22), 0  ;;  %s208_s27 = sshll.u32 %s1047_s3, 4  ;;  %s209_s27 = int_to_ptr.hbm [resolvable:$true] %s208_s27 }
   0x7   : > { %p955_p3 = pnand %p661_p1, %p185_p2  ;;  %s900_s28 = smov [#allocation4]  }
   0x8   : > { %s210_s29 = sshll.u32 %s900_s28, 4  ;;  %s222_s7 = sshll.u32 %s1048_s4, 4  ;;  %s211_s29 = int_to_ptr.vmem [resolvable:$true] %s210_s29  ;;  %s223_s7 = int_to_ptr.hbm [resolvable:$true] %s222_s7 }
   0x9   : > { %p761_p5 = pneg %p955_p3  ;;  %s901_s8 = smov [#allocation6]  }
   0xa   : > { %s224_s9 = sshll.u32 %s901_s8, 4  ;;  %s902_s10 = smov 64   ;;  %s225_s9 = int_to_ptr.vmem [resolvable:$true] %s224_s9 }
   0xb   : > { %p762_p6 = pnand %p959_p4, %p761_p5  ;;  %s903_s11 = smov 4  }
   0xc   : > { %247 = sbr.rel (%p955_p3) target bundleno = 889 (0x379), region = 40 }
   0xd   : > { %764 = dma.hbm_to_vmem [thread:$0]  (!%p762_p6), %s209_s27, 16, %s211_s29, [#allocation5]  }
   0xe   : > { %767 = dma.hbm_to_vmem [thread:$0]  (!%p762_p6), %s223_s7, 1024, %s225_s9, [#allocation7], %s902_s10, %s902_s10, %s903_s11  }
  0x11   : > { %881 = dma.done.wait (%p959_p4), [#allocation5], 16  }
  0x12   : > { %883 = vsyncadd (%p959_p4), [#allocation5], 4294967280 }
  0x13   : > { %885 = dma.done.wait (%p959_p4), [#allocation7], 1024  }
  0x14   : > { %887 = vsyncadd (%p959_p4), [#allocation7], 4294966272  ;;  %p283_p7 = scmp.lt.s32.totalorder %s890_s18, 1  ;;  %v302_v1 = vlaneseq  ;;  %v301_v16 = vld [vmem:[%s1045_s1] sm:$0xff]  ;;  %v744_v30 = vld [vmem:[%s1046_s2 + $0x38] sm:$0xff] }
  0x15   : > { %v326_v18 = vperm.slane %v301_v16, 0  ;;  %v328_v21 = vperm.slane %v301_v16, 1  ;;  %428 = vmatpush.bf16.msra.mxu0 %v744_v30  ;;  %v743_v31 = vld [vmem:[%s1046_s2 + $0x30] sm:$0xff]  ;;  %v742_v32 = vld [vmem:[%s1046_s2 + $0x28] sm:$0xff]  ;;  %v741_v33 = vld [vmem:[%s1046_s2 + $0x20] sm:$0xff]  ;;  %v353_v47 = vperm.slane %v301_v16, 2 }
  0x16   : > { %s1057_s18 = smov (!%p283_p7, %s890_s18), 1  ;;  %v303_v2 = vand.u32 127, %v302_v1  ;;  %v740_v34 = vld [vmem:[%s1046_s2 + $0x18] sm:$0xff]  ;;  %v739_v35 = vld [vmem:[%s1046_s2 + $0x10] sm:$0xff]  ;;  %v738_v36 = vld [vmem:[%s1046_s2 + $0x8] sm:$0xff]  ;;  %v355_v49 = vperm.slane %v301_v16, 3 }
  0x17   : > { %s669_s12 = sshll.u32 %s1057_s18, 3  ;;  %v737_v38 = vld [vmem:[%s1046_s2] sm:$0xff]  ;;  %v751_v56 = vld [vmem:[#allocation6 + $0x30] sm:$0xff]  ;;  %v750_v57 = vld [vmem:[#allocation6 + $0x28] sm:$0xff] }
  0x18   : > { %s286_s15 = scalar_lea.vmem %s1044_s0, %s669_s12  ;;  %vm304_vm0 = vcmp.lt.s32.totalorder %v303_v2, 32  ;;  %v752_v55 = vld [vmem:[#allocation6 + $0x38] sm:$0xff]  ;;  %v749_v58 = vld [vmem:[#allocation6 + $0x20] sm:$0xff]  ;;  %s295_s21 = scalar_lea.vmem %s1049_s5, %s669_s12 }
  0x19   : > { %v300_v0 = vld [vmem:[%s286_s15] sm:$0xff]  ;;  %429 = vmatpush.bf16.msra.mxu0 %v743_v31  ;;  %534 = vmatpush.bf16.msra.mxu1 %v752_v55 }
  0x1a   : > { %305 = vadd.xlane.f32.xlu0 %v300_v0  ;;  %v800_v59 = vld [vmem:[#allocation4] ss:$0 sm:$0xff] }
  0x1b   : > { %v748_v60 = vld [vmem:[#allocation6 + $0x18] sm:$0xff] }
  0x1d   : > { %430 = vmatpush.bf16.msra.mxu0 %v742_v32  ;;  %535 = vmatpush.bf16.msra.mxu1 %v751_v56  ;;  %v801_v32 = vld [vmem:[%s1045_s1 + $0x4] ss:$0 sm:$0xff] }
  0x21   : > { %431 = vmatpush.bf16.msra.mxu0 %v741_v33  ;;  %536 = vmatpush.bf16.msra.mxu1 %v750_v57 }
  0x25   : > { %432 = vmatpush.bf16.msra.mxu0 %v740_v34  ;;  %537 = vmatpush.bf16.msra.mxu1 %v749_v58 }
  0x29   : > { %433 = vmatpush.bf16.msra.mxu0 %v739_v35  ;;  %538 = vmatpush.bf16.msra.mxu1 %v748_v60 }
  0x2d   : > { %434 = vmatpush.bf16.msra.mxu0 %v738_v36 }
  0x31   : > { %435 = vmatpush.bf16.msra.mxu0 %v737_v38 }
  0x8d   : > { %v306_v3 = vpop.xlane.xlu0 %305 }
  0x8e   : > { %v307_v4 = vmul.f32 0.03125, %v306_v3  ;;  %v746_v3 = vld [vmem:[#allocation6 + $0x8] sm:$0xff] }
  0x90   : > { %v308_v5 = vsub.f32 %v300_v0, %v307_v4 }
  0x92   : > { %v309_v6 = vsel %vm304_vm0, %v308_v5, 0.0 }
  0x93   : > { %v310_v7 = vmul.f32 %v309_v6, %v309_v6 }
  0x95   : > { %311 = vadd.xlane.f32.xlu0 %v310_v7  ;;  %v745_v7 = vld [vmem:[#allocation6] sm:$0xff] }
 0x108   : > { %v312_v8 = vpop.xlane.xlu0 %311 }
 0x109   : > { %v313_v9 = vmul.f32 0.03125, %v312_v8 }
 0x10b   : > { %v314_v10 = vadd.f32 1e-05, %v313_v9 }
 0x10d   : > { %802 = vrsqrt.f32 %v314_v10  ;;  %vm321_vm2 = vweird.f32 %v314_v10 }
 0x113   : > { %v803_v11 = vpop.eup %802 }
 0x114   : > { %v316_v12 = vmul.f32 %v803_v11, %v314_v10  ;;  %vm322_vm1 = vweird.f32 %v803_v11 }
 0x115   : > { %vm323_vm3 = vmor %vm321_vm2, %vm322_vm1 }
 0x116   : > { %v317_v13 = vmul.f32 %v803_v11, %v316_v12 }
 0x118   : > { %v318_v14 = vmul.f32 0.5, %v317_v13 }
 0x11a   : > { %v319_v15 = vsub.f32 1.5, %v318_v14 }
 0x11c   : > { %v320_v17 = vmul.f32 %v803_v11, %v319_v15 }
 0x11e   : > { %v324_v19 = vsel %vm323_vm3, %v803_v11, %v320_v17 }
 0x11f   : > { %v325_v20 = vmul.f32 %v324_v19, %v309_v6 }
 0x121   : > { %v327_v22 = vmul.f32 %v326_v18, %v325_v20 }
 0x123   : > { %v329_v23 = vadd.f32 %v328_v21, %v327_v22 }
 0x125   : > { %v997_v24 = vadd.f32 %v329_v23, %v300_v0  ;;  %v747_v0 = vld [vmem:[#allocation6 + $0x10] sm:$0xff] }
 0x126   : > { %539 = vmatpush.bf16.msra.mxu1 %v747_v0 }
 0x127   : > { %332 = vadd.xlane.f32.xlu1 %v997_v24 }
 0x12a   : > { %540 = vmatpush.bf16.msra.mxu1 %v746_v3 }
 0x12e   : > { %541 = vmatpush.bf16.msra.mxu1 %v745_v7 }
 0x19a   : > { %v333_v25 = vpop.xlane.xlu1 %332 }
 0x19b   : > { %v334_v26 = vmul.f32 0.03125, %v333_v25 }
 0x19d   : > { %v335_v27 = vsub.f32 %v997_v24, %v334_v26 }
 0x19f   : > { %v336_v28 = vsel %vm304_vm0, %v335_v27, 0.0 }
 0x1a0   : > { %v337_v29 = vmul.f32 %v336_v28, %v336_v28 }
 0x1a2   : > { %338 = vadd.xlane.f32.xlu1 %v337_v29 }
 0x215   : > { %v339_v37 = vpop.xlane.xlu1 %338 }
 0x216   : > { %v340_v39 = vmul.f32 0.03125, %v339_v37 }
 0x218   : > { %v341_v40 = vadd.f32 1e-05, %v340_v39 }
 0x21a   : > { %804 = vrsqrt.f32 %v341_v40  ;;  %vm348_vm5 = vweird.f32 %v341_v40 }
 0x220   : > { %v805_v41 = vpop.eup %804 }
 0x221   : > { %v343_v42 = vmul.f32 %v805_v41, %v341_v40  ;;  %vm349_vm4 = vweird.f32 %v805_v41 }
 0x222   : > { %vm350_vm6 = vmor %vm348_vm5, %vm349_vm4 }
 0x223   : > { %v344_v43 = vmul.f32 %v805_v41, %v343_v42 }
 0x225   : > { %v345_v44 = vmul.f32 0.5, %v344_v43 }
 0x227   : > { %v346_v45 = vsub.f32 1.5, %v345_v44 }
 0x229   : > { %v347_v46 = vmul.f32 %v805_v41, %v346_v45 }
 0x22b   : > { %v351_v48 = vsel %vm350_vm6, %v805_v41, %v347_v46 }
 0x22c   : > { %v352_v50 = vmul.f32 %v351_v48, %v336_v28 }
 0x22e   : > { %v354_v51 = vmul.f32 %v353_v47, %v352_v50 }
 0x230   : > { %v356_v52 = vadd.f32 %v355_v49, %v354_v51 }
 0x232   : > { %v357_v53 = vpack.c.bf16 %v356_v52, %v356_v52 }
 0x234   : > { %358 = vst [vmem:[#allocation3] sm:$0xf] %v357_v53 }
 0x23b   : > { %v359_v54 = vld [vmem:[#allocation3] sm:$0xf] }
 0x23c   : > { %436 = vmatmul.bf16.vlgmr.msra.gmra.mxu0 %v359_v54 }
 0x2b9   : > { %v437_v61 = vpop.f32.mrf.mxu0 }
 0x2ba   : > { %v438_v62 = vadd.f32 %v800_v59, %v437_v61 }
 0x2bc   : > { %v441_v63 = vpack.c.bf16 %v438_v62, %v438_v62 }
 0x2be   : > { %v442_v1 = vunpack.c.l.bf16 %v441_v63 }
 0x2c0   : > { %v445_v2 = vmul.f32 0.044677734, %v442_v1  ;;  %v443_v21 = vmul.f32 0.5, %v442_v1 }
 0x2c1   : > { %v439_v4 = vpop.f32.mrf.mxu0 }
 0x2c2   : > { %v446_v5 = vpack.c.bf16 %v445_v2, %v445_v2  ;;  %v444_v25 = vpack.c.bf16 %v443_v21, %v443_v21 }
 0x2c4   : > { %v447_v6 = vunpack.c.l.bf16 %v446_v5  ;;  %v465_v28 = vunpack.c.l.bf16 %v444_v25 }
 0x2c6   : > { %v448_v8 = vmul.f32 %v447_v6, %v442_v1 }
 0x2c8   : > { %v449_v9 = vpack.c.bf16 %v448_v8, %v448_v8 }
 0x2ca   : > { %v450_v10 = vunpack.c.l.bf16 %v449_v9 }
 0x2cc   : > { %v451_v11 = vmul.f32 %v450_v10, %v442_v1 }
 0x2ce   : > { %v452_v12 = vpack.c.bf16 %v451_v11, %v451_v11 }
 0x2d0   : > { %v453_v13 = vunpack.c.l.bf16 %v452_v12 }
 0x2d2   : > { %v454_v14 = vadd.f32 %v453_v13, %v442_v1 }
 0x2d4   : > { %v455_v15 = vpack.c.bf16 %v454_v14, %v454_v14 }
 0x2d6   : > { %v456_v16 = vunpack.c.l.bf16 %v455_v15 }
 0x2d8   : > { %v457_v17 = vmul.f32 0.796875, %v456_v16 }
 0x2da   : > { %v458_v18 = vpack.c.bf16 %v457_v17, %v457_v17 }
 0x2dc   : > { %v459_v19 = vunpack.c.l.bf16 %v458_v18 }
 0x2de   : > { %806 = vtanh.f32 %v459_v19 }
 0x2e4   : > { %v807_v20 = vpop.eup %806 }
 0x2e5   : > { %v461_v22 = vpack.c.bf16 %v807_v20, %v807_v20 }
 0x2e7   : > { %v462_v23 = vunpack.c.l.bf16 %v461_v22 }
 0x2e9   : > { %v463_v26 = vadd.f32 1.0, %v462_v23 }
 0x2eb   : > { %v464_v27 = vpack.c.bf16 %v463_v26, %v463_v26 }
 0x2ed   : > { %v466_v29 = vunpack.c.l.bf16 %v464_v27 }
 0x2ef   : > { %v467_v30 = vmul.f32 %v466_v29, %v465_v28 }
 0x2f1   : > { %v468_v31 = vpack.c.bf16 %v467_v30, %v467_v30 }
 0x2f3   : > { %542 = vmatmul.bf16.vlgmr.msra.gmra.mxu1 %v468_v31 }
 0x370   : > { %v543_v33 = vpop.f32.mrf.mxu1 }
 0x371   : > { %v547_v34 = vadd.f32 %v543_v33, %v997_v24 }
 0x373   : > { %v555_v35 = vadd.f32 %v801_v32, %v547_v34 }
 0x375   : > { %556 = vst [vmem:[%s295_s21] sm:$0xff] %v555_v35 }
 0x378   : > { %v545_v36 = vpop.f32.mrf.mxu1 }
 0x379 PF: > { %s17_s20 = sadd.s32 1, %s898_s20   ;;  %s1052_s18 = smov %s894_s19 }
 0x37a   : > { %p14_p8 = scmp.ge.s32.totalorder %s17_s20, 4   ;;  %s1053_s19 = smov %s1055_s22 }
 0x37c   :  { %16 = sbr.rel (!%p14_p8) target bundleno = 3 (0x3), region = 92 }
 0x381   :  { %576 = vsyncpa [#allocation5], 1 }
 0x382   :  { %578 = vsyncpa [#allocation5 + $0x1], 1 }
 0x383   :  { %579 = vsyncpa [#allocation7], 1 }

// kernel: _run.2
= control target key start
LH: loop header
LB: loop body
LE: loop exit
PB: predicated region body
PF: predicated region fallthrough
CT: control target
= control target key end

     0   :  { %10 = vsyncpa [#allocation5], 0  ;;  %s1152_s0 = inlined_call_operand.vmem [shape: f32[16,128], index: 0, kind: input, shape index: {}]   ;;  %s1153_s1 = inlined_call_operand.hbm [shape: f32[8,128], index: 1, kind: input, shape index: {}]   ;;  %s1154_s2 = inlined_call_operand.hbm [shape: bf16[128,128], index: 2, kind: input, shape index: {}]   ;;  %s1155_s3 = inlined_call_operand.hbm [shape: f32[1,128], index: 3, kind: input, shape index: {}]   ;;  %s1156_s4 = inlined_call_operand.hbm [shape: bf16[128,128], index: 4, kind: input, shape index: {}]   ;;  %s1157_s5 = inlined_call_operand.vmem [shape: f32[16,128], index: 5, kind: output, shape index: {}]  }
   0x1   :  { %11 = vsyncpa [#allocation7], 0 }
   0x2   :  { %12 = vsyncpa [#allocation10], 0  ;;  %s1050_s18 = smov 0   ;;  %s1052_s19 = smov 0  }
   0x3   :  { %s1054_s20 = smov 0  }
   0x4 LB: > { %s211_s23 = sshll.u32 %s1154_s2, 4  ;;  %s686_s24 = sadd.s32 4294967295, %s1012_s20   ;;  %s1012_s20 = sphi %s1054_s20, %s18_s20   ;;  %s1008_s19 = sphi %s1052_s19, %s1162_s19   ;;  %s1004_s18 = sphi %s1050_s18, %s1161_s18   ;;  %s212_s23 = int_to_ptr.hbm [resolvable:$true] %s211_s23 }
   0x5   : > { %p688_p0 = scmp.ge.s32.totalorder %s1012_s20, 1  ;;  %p186_p1 = scmp.lt.s32.totalorder %s1012_s20, 3 }
   0x6   : > { %p1071_p2 = scmp.eq.s32.totalorder %s686_s24, 0  ;;  %s1014_s27 = smov [#allocation6]  }
   0x7   : > { %p1075_p3 = pnand %p688_p0, %p186_p1  ;;  %s213_s28 = sshll.u32 %s1014_s27, 4  ;;  %s214_s28 = int_to_ptr.vmem [resolvable:$true] %s213_s28 }
   0x8   : > { %s30_s30 = sadd.s32 1, %s1008_s19  ;;  %s1015_s6 = smov 64  }
   0x9   : > { %p799_p4 = pneg %p1075_p3  ;;  %p32_p6 = scmp.ge.s32.totalorder %s30_s30, 2 }
   0xa   : > { %s1016_s7 = smov 4   ;;  %s198_s10 = sshll.u32 %s1153_s1, 4  ;;  %s199_s10 = int_to_ptr.hbm [resolvable:$true] %s198_s10 }
   0xb   : > { %p1083_p5 = pnand %p1071_p2, %p799_p4  ;;  %s1164_s30 = smov (%p32_p6, %s30_s30), 0 }
   0xc   : > { %s1017_s11 = smov [#allocation4]   ;;  %s227_s15 = sshll.u32 %s1155_s3, 4  ;;  %s228_s15 = int_to_ptr.hbm [resolvable:$true] %s227_s15 }
   0xd   : > { %805 = dma.hbm_to_vmem [thread:$0]  (!%p1083_p5), %s212_s23, 1024, %s214_s28, [#allocation7], %s1015_s6, %s1015_s6, %s1016_s7  }
   0xe   : > { %s200_s12 = sshll.u32 %s1017_s11, 4  ;;  %s1018_s16 = smov [#allocation8]   ;;  %s201_s12 = int_to_ptr.vmem [resolvable:$true] %s200_s12 }
   0xf   : > { %802 = dma.hbm_to_vmem [thread:$0]  (!%p1083_p5), %s199_s10, 128, %s201_s12, [#allocation5]  }
  0x10   : > { %s229_s17 = sshll.u32 %s1018_s16, 4  ;;  %s241_s23 = sshll.u32 %s1156_s4, 4  ;;  %s230_s17 = int_to_ptr.vmem [resolvable:$true] %s229_s17  ;;  %s242_s23 = int_to_ptr.hbm [resolvable:$true] %s241_s23 }
  0x11   : > { %808 = dma.hbm_to_vmem [thread:$0]  (!%p1083_p5), %s228_s15, 16, %s230_s17, [#allocation7]  }
  0x12   : > { %s1019_s24 = smov [#allocation9]   ;;  %266 = sbr.rel (%p1075_p3) target bundleno = 897 (0x381), region = 40 }
  0x13   : > { %s243_s27 = sshll.u32 %s1019_s24, 4  ;;  %s244_s27 = int_to_ptr.vmem [resolvable:$true] %s243_s27 }
  0x14   : > { %811 = dma.hbm_to_vmem [thread:$0]  (!%p1083_p5), %s242_s23, 1024, %s244_s27, [#allocation10], %s1015_s6, %s1015_s6, %s1016_s7  }
  0x17   : > { %991 = dma.done.wait (%p1071_p2), [#allocation5], 128  }
  0x18   : > { %993 = vsyncadd (%p1071_p2), [#allocation5], 4294967168 }
  0x19   : > { %995 = dma.done.wait (%p1071_p2), [#allocation7], 1040  }
  0x1a   : > { %997 = vsyncadd (%p1071_p2), [#allocation7], 4294966256 }
  0x1b   : > { %999 = dma.done.wait (%p1071_p2), [#allocation10], 1024  }
  0x1c   : > { %1001 = vsyncadd (%p1071_p2), [#allocation10], 4294966272  ;;  %p308_p7 = scmp.lt.s32.totalorder %s1004_s18, 1  ;;  %v323_v1 = vlaneseq  ;;  %v322_v16 = vld [vmem:[#allocation4] sm:$0xff]  ;;  %v773_v31 = vld [vmem:[#allocation6 + $0x30] sm:$0xff] }
  0x1d   : > { %v347_v18 = vperm.slane %v322_v16, 0  ;;  %v349_v21 = vperm.slane %v322_v16, 1  ;;  %v774_v30 = vld [vmem:[#allocation6 + $0x38] sm:$0xff]  ;;  %v772_v32 = vld [vmem:[#allocation6 + $0x28] sm:$0xff]  ;;  %v771_v33 = vld [vmem:[#allocation6 + $0x20] sm:$0xff]  ;;  %v374_v47 = vperm.slane %v322_v16, 2 }
  0x1e   : > { %s1166_s18 = smov (!%p308_p7, %s1004_s18), 1  ;;  %v324_v2 = vand.u32 127, %v323_v1  ;;  %449 = vmatpush.bf16.msra.mxu0 %v774_v30  ;;  %v770_v34 = vld [vmem:[#allocation6 + $0x18] sm:$0xff]  ;;  %v769_v35 = vld [vmem:[#allocation6 + $0x10] sm:$0xff]  ;;  %v768_v36 = vld [vmem:[#allocation6 + $0x8] sm:$0xff]  ;;  %v376_v49 = vperm.slane %v322_v16, 3 }
  0x1f   : > { %s699_s26 = sshll.u32 %s1166_s18, 3  ;;  %v767_v38 = vld [vmem:[#allocation6] sm:$0xff]  ;;  %v781_v56 = vld [vmem:[#allocation9 + $0x30] sm:$0xff]  ;;  %v780_v57 = vld [vmem:[#allocation9 + $0x28] sm:$0xff] }
  0x20   : > { %s311_s6 = scalar_lea.vmem %s1152_s0, %s699_s26  ;;  %vm325_vm0 = vcmp.lt.s32.totalorder %v324_v2, 32  ;;  %v782_v55 = vld [vmem:[#allocation9 + $0x38] sm:$0xff]  ;;  %v779_v58 = vld [vmem:[#allocation9 + $0x20] sm:$0xff]  ;;  %s316_s8 = scalar_lea.vmem %s1157_s5, %s699_s26 }
  0x21   : > { %v321_v0 = vld [vmem:[%s311_s6] sm:$0xff]  ;;  %555 = vmatpush.bf16.msra.mxu1 %v782_v55  ;;  %v850_v59 = vld [vmem:[#allocation8] ss:$0 sm:$0xff] }
  0x22   : > { %326 = vadd.xlane.f32.xlu0 %v321_v0  ;;  %450 = vmatpush.bf16.msra.mxu0 %v773_v31  ;;  %v778_v60 = vld [vmem:[#allocation9 + $0x18] sm:$0xff] }
  0x25   : > { %556 = vmatpush.bf16.msra.mxu1 %v781_v56 }
  0x26   : > { %451 = vmatpush.bf16.msra.mxu0 %v772_v32  ;;  %v851_v32 = vld [vmem:[#allocation4 + $0x4] ss:$0 sm:$0xff] }
  0x29   : > { %557 = vmatpush.bf16.msra.mxu1 %v780_v57 }
  0x2a   : > { %452 = vmatpush.bf16.msra.mxu0 %v771_v33 }
  0x2d   : > { %558 = vmatpush.bf16.msra.mxu1 %v779_v58 }
  0x2e   : > { %453 = vmatpush.bf16.msra.mxu0 %v770_v34 }
  0x31   : > { %559 = vmatpush.bf16.msra.mxu1 %v778_v60 }
  0x32   : > { %454 = vmatpush.bf16.msra.mxu0 %v769_v35 }
  0x36   : > { %455 = vmatpush.bf16.msra.mxu0 %v768_v36 }
  0x3a   : > { %456 = vmatpush.bf16.msra.mxu0 %v767_v38 }
  0x95   : > { %v327_v3 = vpop.xlane.xlu0 %326 }
  0x96   : > { %v328_v4 = vmul.f32 0.03125, %v327_v3  ;;  %v776_v3 = vld [vmem:[#allocation9 + $0x8] sm:$0xff] }
  0x98   : > { %v329_v5 = vsub.f32 %v321_v0, %v328_v4 }
  0x9a   : > { %v330_v6 = vsel %vm325_vm0, %v329_v5, 0.0 }
  0x9b   : > { %v331_v7 = vmul.f32 %v330_v6, %v330_v6 }
  0x9d   : > { %332 = vadd.xlane.f32.xlu0 %v331_v7  ;;  %v775_v7 = vld [vmem:[#allocation9] sm:$0xff] }
 0x110   : > { %v333_v8 = vpop.xlane.xlu0 %332 }
 0x111   : > { %v334_v9 = vmul.f32 0.03125, %v333_v8 }
 0x113   : > { %v335_v10 = vadd.f32 1e-05, %v334_v9 }
 0x115   : > { %852 = vrsqrt.f32 %v335_v10  ;;  %vm342_vm2 = vweird.f32 %v335_v10 }
 0x11b   : > { %v853_v11 = vpop.eup %852 }
 0x11c   : > { %v337_v12 = vmul.f32 %v853_v11, %v335_v10  ;;  %vm343_vm1 = vweird.f32 %v853_v11 }
 0x11d   : > { %vm344_vm3 = vmor %vm342_vm2, %vm343_vm1 }
 0x11e   : > { %v338_v13 = vmul.f32 %v853_v11, %v337_v12 }
 0x120   : > { %v339_v14 = vmul.f32 0.5, %v338_v13 }
 0x122   : > { %v340_v15 = vsub.f32 1.5, %v339_v14 }
 0x124   : > { %v341_v17 = vmul.f32 %v853_v11, %v340_v15 }
 0x126   : > { %v345_v19 = vsel %vm344_vm3, %v853_v11, %v341_v17 }
 0x127   : > { %v346_v20 = vmul.f32 %v345_v19, %v330_v6 }
 0x129   : > { %v348_v22 = vmul.f32 %v347_v18, %v346_v20 }
 0x12b   : > { %v350_v23 = vadd.f32 %v349_v21, %v348_v22 }
 0x12d   : > { %v1132_v24 = vadd.f32 %v350_v23, %v321_v0  ;;  %v777_v0 = vld [vmem:[#allocation9 + $0x10] sm:$0xff] }
 0x12e   : > { %560 = vmatpush.bf16.msra.mxu1 %v777_v0 }
 0x12f   : > { %353 = vadd.xlane.f32.xlu1 %v1132_v24 }
 0x132   : > { %561 = vmatpush.bf16.msra.mxu1 %v776_v3 }
 0x136   : > { %562 = vmatpush.bf16.msra.mxu1 %v775_v7 }
 0x1a2   : > { %v354_v25 = vpop.xlane.xlu1 %353 }
 0x1a3   : > { %v355_v26 = vmul.f32 0.03125, %v354_v25 }
 0x1a5   : > { %v356_v27 = vsub.f32 %v1132_v24, %v355_v26 }
 0x1a7   : > { %v357_v28 = vsel %vm325_vm0, %v356_v27, 0.0 }
 0x1a8   : > { %v358_v29 = vmul.f32 %v357_v28, %v357_v28 }
 0x1aa   : > { %359 = vadd.xlane.f32.xlu1 %v358_v29 }
 0x21d   : > { %v360_v37 = vpop.xlane.xlu1 %359 }
 0x21e   : > { %v361_v39 = vmul.f32 0.03125, %v360_v37 }
 0x220   : > { %v362_v40 = vadd.f32 1e-05, %v361_v39 }
 0x222   : > { %854 = vrsqrt.f32 %v362_v40  ;;  %vm369_vm5 = vweird.f32 %v362_v40 }
 0x228   : > { %v855_v41 = vpop.eup %854 }
 0x229   : > { %v364_v42 = vmul.f32 %v855_v41, %v362_v40  ;;  %vm370_vm4 = vweird.f32 %v855_v41 }
 0x22a   : > { %vm371_vm6 = vmor %vm369_vm5, %vm370_vm4 }
 0x22b   : > { %v365_v43 = vmul.f32 %v855_v41, %v364_v42 }
 0x22d   : > { %v366_v44 = vmul.f32 0.5, %v365_v43 }
 0x22f   : > { %v367_v45 = vsub.f32 1.5, %v366_v44 }
 0x231   : > { %v368_v46 = vmul.f32 %v855_v41, %v367_v45 }
 0x233   : > { %v372_v48 = vsel %vm371_vm6, %v855_v41, %v368_v46 }
 0x234   : > { %v373_v50 = vmul.f32 %v372_v48, %v357_v28 }
 0x236   : > { %v375_v51 = vmul.f32 %v374_v47, %v373_v50 }
 0x238   : > { %v377_v52 = vadd.f32 %v376_v49, %v375_v51 }
 0x23a   : > { %v378_v53 = vpack.c.bf16 %v377_v52, %v377_v52 }
 0x23c   : > { %379 = vst [vmem:[#allocation3] sm:$0xf] %v378_v53 }
 0x243   : > { %v380_v54 = vld [vmem:[#allocation3] sm:$0xf] }
 0x244   : > { %457 = vmatmul.bf16.vlgmr.msra.gmra.mxu0 %v380_v54 }
 0x2c1   : > { %v458_v61 = vpop.f32.mrf.mxu0 }
 0x2c2   : > { %v459_v62 = vadd.f32 %v850_v59, %v458_v61 }
 0x2c4   : > { %v462_v63 = vpack.c.bf16 %v459_v62, %v459_v62 }
 0x2c6   : > { %v463_v1 = vunpack.c.l.bf16 %v462_v63 }
 0x2c8   : > { %v466_v2 = vmul.f32 0.044677734, %v463_v1  ;;  %v464_v21 = vmul.f32 0.5, %v463_v1 }
 0x2c9   : > { %v460_v4 = vpop.f32.mrf.mxu0 }
 0x2ca   : > { %v467_v5 = vpack.c.bf16 %v466_v2, %v466_v2  ;;  %v465_v25 = vpack.c.bf16 %v464_v21, %v464_v21 }
 0x2cc   : > { %v468_v6 = vunpack.c.l.bf16 %v467_v5  ;;  %v486_v28 = vunpack.c.l.bf16 %v465_v25 }
 0x2ce   : > { %v469_v8 = vmul.f32 %v468_v6, %v463_v1 }
 0x2d0   : > { %v470_v9 = vpack.c.bf16 %v469_v8, %v469_v8 }
 0x2d2   : > { %v471_v10 = vunpack.c.l.bf16 %v470_v9 }
 0x2d4   : > { %v472_v11 = vmul.f32 %v471_v10, %v463_v1 }
 0x2d6   : > { %v473_v12 = vpack.c.bf16 %v472_v11, %v472_v11 }
 0x2d8   : > { %v474_v13 = vunpack.c.l.bf16 %v473_v12 }
 0x2da   : > { %v475_v14 = vadd.f32 %v474_v13, %v463_v1 }
 0x2dc   : > { %v476_v15 = vpack.c.bf16 %v475_v14, %v475_v14 }
 0x2de   : > { %v477_v16 = vunpack.c.l.bf16 %v476_v15 }
 0x2e0   : > { %v478_v17 = vmul.f32 0.796875, %v477_v16 }
 0x2e2   : > { %v479_v18 = vpack.c.bf16 %v478_v17, %v478_v17 }
 0x2e4   : > { %v480_v19 = vunpack.c.l.bf16 %v479_v18 }
 0x2e6   : > { %856 = vtanh.f32 %v480_v19 }
 0x2ec   : > { %v857_v20 = vpop.eup %856 }
 0x2ed   : > { %v482_v22 = vpack.c.bf16 %v857_v20, %v857_v20 }
 0x2ef   : > { %v483_v23 = vunpack.c.l.bf16 %v482_v22 }
 0x2f1   : > { %v484_v26 = vadd.f32 1.0, %v483_v23 }
 0x2f3   : > { %v485_v27 = vpack.c.bf16 %v484_v26, %v484_v26 }
 0x2f5   : > { %v487_v29 = vunpack.c.l.bf16 %v485_v27 }
 0x2f7   : > { %v488_v30 = vmul.f32 %v487_v29, %v486_v28 }
 0x2f9   : > { %v489_v31 = vpack.c.bf16 %v488_v30, %v488_v30 }
 0x2fb   : > { %563 = vmatmul.bf16.vlgmr.msra.gmra.mxu1 %v489_v31 }
 0x378   : > { %v564_v33 = vpop.f32.mrf.mxu1 }
 0x379   : > { %v568_v34 = vadd.f32 %v564_v33, %v1132_v24 }
 0x37b   : > { %v576_v35 = vadd.f32 %v851_v32, %v568_v34 }
 0x37d   : > { %577 = vst [vmem:[%s316_s8] sm:$0xff] %v576_v35 }
 0x380   : > { %v566_v36 = vpop.f32.mrf.mxu1 }
 0x381 PF: > { %s18_s20 = sadd.s32 1, %s1012_s20   ;;  %s1161_s18 = smov %s1008_s19 }
 0x382   : > { %p15_p8 = scmp.ge.s32.totalorder %s18_s20, 4   ;;  %s1162_s19 = smov %s1164_s30 }
 0x384   :  { %17 = sbr.rel (!%p15_p8) target bundleno = 4 (0x4), region = 98 }
 0x389   :  { %597 = vsyncpa [#allocation5], 1 }
 0x38a   :  { %599 = vsyncpa [#allocation5 + $0x1], 1 }
 0x38b   :  { %600 = vsyncpa [#allocation7], 1 }
 0x38c   :  { %601 = vsyncpa [#allocation10], 1 }

</bundles_post_ra>
